<compile_context>
chip_gen: v7x
topology: tpu7x:2x2x1
jax: 0.10.0
libtpu: 0.0.40
codegen_flags: <defaults>
</compile_context>

<pallas_src>
import functools

import jax
import jax.numpy as jnp
from jax import lax
from jax.experimental import pallas as pl
from jax.experimental.pallas import tpu as pltpu


def _lowest(dtype):
    # PyTorch MaxPool2d pads with -inf for floats; use iinfo.min for ints.
    if jnp.issubdtype(dtype, jnp.floating):
        return float("-inf")
    return int(jnp.iinfo(dtype).min)


def _round_up(a, b):
    return -(-a // b) * b


def _shift_fwd(x, d, axis, neg):
    """y[t] = x[t + d] along `axis` for t < n - d, else `neg` (static d >= 1)."""
    n = x.shape[axis]
    fill = jnp.asarray(neg, dtype=x.dtype)
    if d >= n:
        return jnp.full(x.shape, fill, dtype=x.dtype)
    if axis == x.ndim - 1 and n % 128 == 0:
        # Lane axis, vreg-aligned width: XLU rotate + VPU select, no VMEM
        # concat / relayout (perf-review item 1/3).
        rolled = pltpu.roll(x, shift=n - d, axis=axis)   # rolled[t] = x[(t+d) % n]
        idx = lax.broadcasted_iota(jnp.int32, x.shape, axis)
        return jnp.where(idx < n - d, rolled, fill)
    # Sublane axis (cheap sublane-offset copy) or ragged lane widths where the
    # Mosaic lane-rotate path is not guaranteed: static slice + small fill.
    head = lax.slice_in_dim(x, d, n, axis=axis)
    pad_shape = x.shape[:axis] + (d,) + x.shape[axis + 1:]
    return jnp.concatenate([head, jnp.full(pad_shape, fill, x.dtype)], axis=axis)


def _pool_axis_pieces(x, axis, k, s, out_len, neg):
    """MaxPool1d(k, stride=s, pad=k//2, -inf fill) along `axis`.

    Returns (first, body):
      first = output[0]   (length 1 along `axis`, the left-padded window)
      body  = output[1:]  (length out_len - 1 along `axis`)

    Key identity: with w[t] = max(x[t .. t+k-s]), the s-wide block max of w,
    block j = max(w[j*s .. j*s+s-1]) = max(x[j*s .. j*s+k-1]) = output[j + 1].
    So one shifted-max build + ONE block reduce replaces the old redundant
    per-block reductions and border concats (perf-review items 1-3).
    """
    n = x.shape[axis]
    m2 = k - s + 1                      # sliding-window length for the identity

    # w[t] = max(x[t .. t+m2-1]) via log-doubled shifted maxima.
    w = x
    cur = 1
    while cur < m2:
        d = min(cur, m2 - cur)
        w = jnp.maximum(w, _shift_fwd(w, d, axis, neg))
        cur += d

    # body[j] = max(w[j*s .. j*s+s-1]) = output[j + 1]
    if s == 1:
        body = w
    else:
        nb = n // s
        wr = w.reshape(w.shape[:axis] + (nb, s) + w.shape[axis + 1:])
        # TODO(synk): this single stride-aligned block reduce is the one
        # remaining relayout; replace with a strided lane gather once Mosaic
        # reliably supports value-level strided slices.
        body = jnp.max(wr, axis=axis + 1)
    need = out_len - 1
    if need < body.shape[axis]:
        body = lax.slice_in_dim(body, 0, need, axis=axis)

    # output[0]: window [-s, k-1-s] -> in-range part [0, k-s-1].
    first = jnp.max(lax.slice_in_dim(x, 0, k - s, axis=axis),
                    axis=axis, keepdims=True)
    return first, body


def _c1_kernel(*refs, size):
    """One grid step = one (batch, channel-tile) block, all scales.

    refs[:-1]: S input refs, each [c_tile, H, W]   (one per scale)
    refs[-1] : output ref,     [c_tile, H_out, W_out]
    """
    x_refs, o_ref = refs[:-1], refs[-1]
    k, s = size, size // 2
    _, h_out, w_out = o_ref.shape
    neg = _lowest(x_refs[0].dtype)

    # Max over scales (commutes with max-pool); done in every grid step so the
    # work is uniform and overlapped with the next step's DMA.
    x = x_refs[0][...]
    for r in x_refs[1:]:
        x = jnp.maximum(x, r[...])                          # [c_tile, H, W]

    # Pool H (sublane axis); assemble the rows with one sublane-axis concat
    # (lane layout untouched).
    h_first, h_body = _pool_axis_pieces(x, axis=1, k=k, s=s, out_len=h_out,
                                        neg=neg)
    y = jnp.concatenate([h_first, h_body], axis=1)          # [c_tile, H_out, W]

    # Pool W (lane axis); the two column groups are stored straight into the
    # output ref so no lane-axis concatenation is ever materialized.
    w_first, w_body = _pool_axis_pieces(y, axis=2, k=k, s=s, out_len=w_out,
                                        neg=neg)
    o_ref[:, :, 0:1] = w_first.astype(o_ref.dtype)
    o_ref[:, :, 1:] = w_body.astype(o_ref.dtype)


def c1_forward(s1_outputs, size):
    """JAX/Pallas equivalent of C1(size).forward(s1_outputs).

    s1_outputs: list of NCHW arrays [B, C, H, W], one per scale.
    Returns [B, C, H_out, W_out].
    """
    s1_outputs = list(s1_outputs)
    S = len(s1_outputs)
    B, C, H, W = s1_outputs[0].shape
    dtype = s1_outputs[0].dtype
    k, s, p = size, size // 2, size // 2
    assert s >= 1 and H % s == 0 and W % s == 0, (
        "spatial dims must be multiples of the stride")
    n_blk = -(-k // s)
    assert H // s >= n_blk - 1 and W // s >= n_blk - 1, "spatial dims too small"
    h_out = (H + 2 * p - k) // s + 1
    w_out = (W + 2 * p - k) // s + 1
    itemsize = jnp.dtype(dtype).itemsize

    # Channel tile: the largest divisor of C whose per-step input traffic stays
    # around the ~2 MiB sweet spot (amortizes per-step overhead, bounds VMEM).
    target_bytes = 2 * 1024 * 1024
    per_chan = S * H * W * itemsize
    c_tile = 1
    for cand in range(C, 0, -1):
        if C % cand == 0 and cand * per_chan <= target_bytes:
            c_tile = cand
            break
    # Guarantee at least two grid steps so pipelining / megacore have work.
    if B * (C // c_tile) < 2 and c_tile > 1:
        for cand in range(c_tile - 1, 0, -1):
            if C % cand == 0:
                c_tile = cand
                break

    grid = (B, C // c_tile)
    in_spec = pl.BlockSpec((None, c_tile, H, W), lambda b, c: (b, c, 0, 0))
    out_spec = pl.BlockSpec((None, c_tile, h_out, w_out),
                            lambda b, c: (b, c, 0, 0))

    # VMEM budget from the actual block sizes: double-buffered pipeline copies
    # + the padded reshape temporaries of the block reduce + headroom, capped
    # safely below v7x's 64 MiB physical VMEM.
    block_in = c_tile * H * W * itemsize
    block_out = c_tile * h_out * w_out * itemsize
    tmp_w = 2 * c_tile * h_out * _round_up(max(W // s, 1), 8) * 128 * itemsize
    tmp_h = 2 * c_tile * max(H // s, 1) * 8 * _round_up(W, 128) * itemsize
    vmem_needed = 2 * (S * block_in + block_out) + tmp_w + tmp_h + (4 << 20)
    vmem_limit = int(min(max(vmem_needed, 16 << 20), 48 << 20))

    cost = pl.CostEstimate(
        flops=(S + 3) * B * C * H * W,                      # ~comparison count
        transcendentals=0,
        bytes_accessed=(S * B * C * H * W + B * C * h_out * w_out) * itemsize)

    kernel = functools.partial(_c1_kernel, size=size)

    # TODO(synk): for very large H*W, tile H with a halo so one channel-tile
    # block still fits VMEM; whole-image blocks are fine for HMAX band sizes.
    return pl.pallas_call(
        kernel,
        out_shape=jax.ShapeDtypeStruct((B, C, h_out, w_out), dtype),
        grid=grid,
        in_specs=[in_spec] * S,
        out_specs=out_spec,
        compiler_params=pltpu.CompilerParams(
            dimension_semantics=("parallel", "parallel"),
            vmem_limit_bytes=vmem_limit),
        cost_estimate=cost,
    )(*s1_outputs)


if __name__ == "__main__":
    key = jax.random.PRNGKey(0)
    size = 4                       # C1(size=4): pool 4x4, stride 2, pad 2
    B, C, H, W = 2, 4, 16, 16
    n_scales = 3
    keys = jax.random.split(key, n_scales)
    s1_outputs = [jax.random.normal(kk, (B, C, H, W), dtype=jnp.float32)
                  for kk in keys]

    out = jax.block_until_ready(c1_forward(s1_outputs, size))

    # Pure-JAX reference with identical semantics (max over scales + MaxPool2d).
    ref = jnp.max(jnp.stack(s1_outputs, 0), axis=0)
    ref = lax.reduce_window(
        ref, -jnp.inf, lax.max,
        window_dimensions=(1, 1, size, size),
        window_strides=(1, 1, size // 2, size // 2),
        padding=((0, 0), (0, 0),
                 (size // 2, size // 2), (size // 2, size // 2)))

    assert out.shape == ref.shape, (out.shape, ref.shape)
    assert jnp.allclose(out, ref), float(jnp.max(jnp.abs(out - ref)))
    print("KERNEL_OK")
</pallas_src>

<mosaic_0001>
module attributes {stable_mosaic.version = 11 : i64} {
  func.func @_c1_kernel(%arg0: i32, %arg1: i32, %arg2: memref<1x4x16x16xf32, #tpu.memory_space<vmem>>, %arg3: memref<1x4x16x16xf32, #tpu.memory_space<vmem>>, %arg4: memref<1x4x16x16xf32, #tpu.memory_space<vmem>>, %arg5: memref<1x4x9x9xf32, #tpu.memory_space<vmem>>) attributes {dimension_semantics = [#tpu.dimension_semantics<parallel>, #tpu.dimension_semantics<parallel>], iteration_bounds = array<i64: 2, 1>, scalar_prefetch = 0 : i64, scratch_operands = 0 : i64, tpu.core_type = #tpu.core_type<tc>, window_params = [{transform_indices = @transform_0, window_bounds = array<i64: 1, 4, 16, 16>}, {transform_indices = @transform_1, window_bounds = array<i64: 1, 4, 16, 16>}, {transform_indices = @transform_2, window_bounds = array<i64: 1, 4, 16, 16>}, {transform_indices = @transform_3, window_bounds = array<i64: 1, 4, 9, 9>}]} {
    %c0 = arith.constant 0 : index
    %c0_0 = arith.constant 0 : index
    %c0_1 = arith.constant 0 : index
    %c0_2 = arith.constant 0 : index
    %0 = vector.load %arg2[%c0, %c0_0, %c0_1, %c0_2] : memref<1x4x16x16xf32, #tpu.memory_space<vmem>>, vector<1x4x16x16xf32>
    %1 = vector.shape_cast %0 : vector<1x4x16x16xf32> to vector<4x16x16xf32>
    %c0_3 = arith.constant 0 : index
    %c0_4 = arith.constant 0 : index
    %c0_5 = arith.constant 0 : index
    %c0_6 = arith.constant 0 : index
    %2 = vector.load %arg3[%c0_3, %c0_4, %c0_5, %c0_6] : memref<1x4x16x16xf32, #tpu.memory_space<vmem>>, vector<1x4x16x16xf32>
    %3 = vector.shape_cast %2 : vector<1x4x16x16xf32> to vector<4x16x16xf32>
    %4 = arith.maximumf %1, %3 : vector<4x16x16xf32>
    %c0_7 = arith.constant 0 : index
    %c0_8 = arith.constant 0 : index
    %c0_9 = arith.constant 0 : index
    %c0_10 = arith.constant 0 : index
    %5 = vector.load %arg4[%c0_7, %c0_8, %c0_9, %c0_10] : memref<1x4x16x16xf32, #tpu.memory_space<vmem>>, vector<1x4x16x16xf32>
    %6 = vector.shape_cast %5 : vector<1x4x16x16xf32> to vector<4x16x16xf32>
    %7 = arith.maximumf %4, %6 : vector<4x16x16xf32>
    %8 = vector.extract_strided_slice %7 {offsets = [0, 1, 0], sizes = [4, 15, 16], strides = [1, 1, 1]} : vector<4x16x16xf32> to vector<4x15x16xf32>
    %cst = arith.constant 0xFF800000 : f32
    %9 = vector.broadcast %cst : f32 to vector<4x1x16xf32>
    %10 = tpu.concatenate %8, %9 in 1 : vector<4x15x16xf32>, vector<4x1x16xf32> -> vector<4x16x16xf32>
    %11 = arith.maximumf %7, %10 : vector<4x16x16xf32>
    %12 = vector.extract_strided_slice %11 {offsets = [0, 1, 0], sizes = [4, 15, 16], strides = [1, 1, 1]} : vector<4x16x16xf32> to vector<4x15x16xf32>
    %cst_11 = arith.constant 0xFF800000 : f32
    %13 = vector.broadcast %cst_11 : f32 to vector<4x1x16xf32>
    %14 = tpu.concatenate %12, %13 in 1 : vector<4x15x16xf32>, vector<4x1x16xf32> -> vector<4x16x16xf32>
    %15 = arith.maximumf %11, %14 : vector<4x16x16xf32>
    %16 = vector.shape_cast %15 : vector<4x16x16xf32> to vector<4x8x2x16xf32>
    %cst_12 = arith.constant dense<0xFF800000> : vector<4x8x16xf32>
    %17 = vector.multi_reduction <maximumf>, %16, %cst_12 [2] : vector<4x8x2x16xf32> to vector<4x8x16xf32>
    %18 = vector.extract_strided_slice %7 {offsets = [0, 0, 0], sizes = [4, 2, 16], strides = [1, 1, 1]} : vector<4x16x16xf32> to vector<4x2x16xf32>
    %cst_13 = arith.constant dense<0xFF800000> : vector<4x16xf32>
    %19 = vector.multi_reduction <maximumf>, %18, %cst_13 [1] : vector<4x2x16xf32> to vector<4x16xf32>
    %20 = vector.shape_cast %19 : vector<4x16xf32> to vector<4x1x16xf32>
    %21 = tpu.concatenate %20, %17 in 1 : vector<4x1x16xf32>, vector<4x8x16xf32> -> vector<4x9x16xf32>
    %22 = vector.extract_strided_slice %21 {offsets = [0, 0, 1], sizes = [4, 9, 15], strides = [1, 1, 1]} : vector<4x9x16xf32> to vector<4x9x15xf32>
    %cst_14 = arith.constant 0xFF800000 : f32
    %23 = vector.broadcast %cst_14 : f32 to vector<4x9x1xf32>
    %24 = tpu.concatenate %22, %23 in 2 : vector<4x9x15xf32>, vector<4x9x1xf32> -> vector<4x9x16xf32>
    %25 = arith.maximumf %21, %24 : vector<4x9x16xf32>
    %26 = vector.extract_strided_slice %25 {offsets = [0, 0, 1], sizes = [4, 9, 15], strides = [1, 1, 1]} : vector<4x9x16xf32> to vector<4x9x15xf32>
    %cst_15 = arith.constant 0xFF800000 : f32
    %27 = vector.broadcast %cst_15 : f32 to vector<4x9x1xf32>
    %28 = tpu.concatenate %26, %27 in 2 : vector<4x9x15xf32>, vector<4x9x1xf32> -> vector<4x9x16xf32>
    %29 = arith.maximumf %25, %28 : vector<4x9x16xf32>
    %30 = vector.shape_cast %29 : vector<4x9x16xf32> to vector<4x9x8x2xf32>
    %cst_16 = arith.constant dense<0xFF800000> : vector<4x9x8xf32>
    %31 = vector.multi_reduction <maximumf>, %30, %cst_16 [3] : vector<4x9x8x2xf32> to vector<4x9x8xf32>
    %32 = vector.extract_strided_slice %21 {offsets = [0, 0, 0], sizes = [4, 9, 2], strides = [1, 1, 1]} : vector<4x9x16xf32> to vector<4x9x2xf32>
    %cst_17 = arith.constant dense<0xFF800000> : vector<4x9xf32>
    %33 = vector.multi_reduction <maximumf>, %32, %cst_17 [2] : vector<4x9x2xf32> to vector<4x9xf32>
    %34 = vector.shape_cast %33 : vector<4x9xf32> to vector<4x9x1xf32>
    %c0_18 = arith.constant 0 : index
    %c0_19 = arith.constant 0 : index
    %c0_20 = arith.constant 0 : index
    %c0_21 = arith.constant 0 : index
    %35 = vector.load %arg5[%c0_18, %c0_19, %c0_20, %c0_21] : memref<1x4x9x9xf32, #tpu.memory_space<vmem>>, vector<1x4x9x1xf32>
    %36 = vector.shape_cast %35 : vector<1x4x9x1xf32> to vector<4x9x1xf32>
    %37 = vector.shape_cast %34 : vector<4x9x1xf32> to vector<1x4x9x1xf32>
    tpu.vector_store %arg5[%c0_18, %c0_19, %c0_20, %c0_21], %37 {strides = array<i32>} : memref<1x4x9x9xf32, #tpu.memory_space<vmem>>, vector<1x4x9x1xf32>,
    %c0_22 = arith.constant 0 : index
    %c0_23 = arith.constant 0 : index
    %c0_24 = arith.constant 0 : index
    %c1 = arith.constant 1 : index
    %38 = vector.load %arg5[%c0_22, %c0_23, %c0_24, %c1] : memref<1x4x9x9xf32, #tpu.memory_space<vmem>>, vector<1x4x9x8xf32>
    %39 = vector.shape_cast %38 : vector<1x4x9x8xf32> to vector<4x9x8xf32>
    %40 = vector.shape_cast %31 : vector<4x9x8xf32> to vector<1x4x9x8xf32>
    tpu.vector_store %arg5[%c0_22, %c0_23, %c0_24, %c1], %40 {strides = array<i32>} : memref<1x4x9x9xf32, #tpu.memory_space<vmem>>, vector<1x4x9x8xf32>,
    return
  }
  func.func @transform_0(%arg0: i32, %arg1: i32) -> (i32, i32, i32, i32) {
    %c0_i32 = arith.constant 0 : i32
    %c0_i32_0 = arith.constant 0 : i32
    %c0_i32_1 = arith.constant 0 : i32
    return %arg0, %arg1, %c0_i32, %c0_i32_0 : i32, i32, i32, i32
  }
  func.func @transform_1(%arg0: i32, %arg1: i32) -> (i32, i32, i32, i32) {
    %c0_i32 = arith.constant 0 : i32
    %c0_i32_0 = arith.constant 0 : i32
    %c0_i32_1 = arith.constant 0 : i32
    return %arg0, %arg1, %c0_i32, %c0_i32_0 : i32, i32, i32, i32
  }
  func.func @transform_2(%arg0: i32, %arg1: i32) -> (i32, i32, i32, i32) {
    %c0_i32 = arith.constant 0 : i32
    %c0_i32_0 = arith.constant 0 : i32
    %c0_i32_1 = arith.constant 0 : i32
    return %arg0, %arg1, %c0_i32, %c0_i32_0 : i32, i32, i32, i32
  }
  func.func @transform_3(%arg0: i32, %arg1: i32) -> (i32, i32, i32, i32) {
    %c0_i32 = arith.constant 0 : i32
    %c0_i32_0 = arith.constant 0 : i32
    %c0_i32_1 = arith.constant 0 : i32
    return %arg0, %arg1, %c0_i32, %c0_i32_0 : i32, i32, i32, i32
  }
}

</mosaic_0001>

<bundles_post_ra>
// kernel: tpu_custom_call.1
= control target key start
LH: loop header
LB: loop body
LE: loop exit
PB: predicated region body
PF: predicated region fallthrough
CT: control target
= control target key end

     0   :  { %8 = vsyncpa [#allocation3], 0  ;;  %s3917_s0 = inlined_call_operand.hbm [shape: f32[2,4,16,16], index: 0, kind: input, shape index: {}]   ;;  %s3918_s1 = inlined_call_operand.hbm [shape: f32[2,4,16,16], index: 1, kind: input, shape index: {}]   ;;  %s3919_s2 = inlined_call_operand.hbm [shape: f32[2,4,16,16], index: 2, kind: input, shape index: {}]   ;;  %s3920_s3 = inlined_call_operand.vmem [shape: f32[2,4,9,9], index: 3, kind: output, shape index: {}]  }
   0x1   :  { %10 = vsyncpa [#allocation3 + $0x1], 0 }
   0x2   :  { %11 = vsyncpa [#allocation5], 0 }
   0x3   :  { %13 = vsyncpa [#allocation5 + $0x1], 0  ;;  %s2752_s12 = smov 0   ;;  %s2754_s13 = smov 0  }
   0x4   :  { %s2756_s14 = smov 0   ;;  %s2758_s15 = smov 0  }
   0x5   :  { %s2760_s16 = smov 0   ;;  %s2762_s17 = smov 0  }
   0x6 LB: > { %s3922_s18 = sadd.s32 4294967295, %s2715_s17   ;;  %s31_s19 = sadd.s32 1, %s2711_s16  ;;  %s2715_s17 = sphi %s2762_s17, %s19_s17   ;;  %s2711_s16 = sphi %s2760_s16, %s3946_s16   ;;  %s2707_s15 = sphi %s2758_s15, %s3945_s15   ;;  %s2703_s14 = sphi %s2756_s14, %s3944_s14   ;;  %s2699_s13 = sphi %s2754_s13, %s3943_s13   ;;  %s2695_s12 = sphi %s2752_s12, %s3942_s12  }
   0x7   : > { %p33_p0 = scmp.ge.s32.totalorder %s31_s19, 2  ;;  %s40_s20 = sadd.s32 1, %s2703_s14 }
   0x8   : > { %p47_p1 = scmp.ne.s32.totalorder %s2703_s14, %s2699_s13  ;;  %p48_p2 = scmp.eq.s32.totalorder %s2715_s17, 0 }
   0x9   : > { %s3948_s19 = smov (%p33_p0, %s31_s19), 0  ;;  %p53_p4 = scmp.ne.s32.totalorder %s2699_s13, %s2695_s12 }
   0xa   : > { %p49_p3 = por %p48_p2, %p47_p1  ;;  %s35_s21 = ssub.s32 %s2711_s16, %s3948_s19 }
   0xb   : > { %p54_p5 = scmp.eq.s32.totalorder %s3922_s18, 0  ;;  %p38_p6 = scmp.eq.s32.totalorder %s35_s21, 0 }
   0xc   : > { %p2510_p8 = scmp.lt.s32.totalorder %s2715_s17, 2  ;;  %s161_s24 = sand.u32 1, %s2703_s14  }
   0xd   : > { %p2793_p7 = por %p54_p5, %p53_p4  ;;  %s2803_s25 = sshll.u32 %s2711_s16, 10 }
   0xe   : > { %s2799_s23 = scalar_select %p38_p6, %s2703_s14, %s40_s20  }
   0xf   : > { %s3924_s22 = scalar_select %p2793_p7, 1, 0 }
  0x10   : > { %s2807_s26 = sshll.u32 %s161_s24, 6  ;;  %p2809_p9 = pnand %p2510_p8, %p49_p3 }
  0x11   : > { %s185_s28 = sand.u32 1, %s2715_s17   ;;  %s2818_s4 = scalar_lea.hbm %s3918_s1, %s2803_s25 }
  0x12   : > { %s189_s5 = scalar_lea.vmem [#allocation4], %s2807_s26  ;;  %s2824_s7 = scalar_lea.sflag [#allocation5], %s185_s28 }
  0x13   : > { %s199_s6 = sshll.u32 %s189_s5, 4  ;;  %s2571_s8 = scalar_lea.hbm %s2818_s4, 1024  ;;  %s2821_s6 = int_to_ptr.vmem [resolvable:$true] %s199_s6 }
  0x14   : > { %p2572_p11 = scmp.ne.s32.totalorder %s2818_s4, %s2571_s8  ;;  %p2830_p12 = pneg %p2809_p9 }
  0x15   : > { %s2576_s12 = scalar_lea.hbm %s3918_s1, 2048  ;;  %p2577_p1 = scmp.lt.u32.totalorder %s2818_s4, %s3918_s1 }
  0x16   : > { %p2574_p13 = pnand %p2830_p12, %p2572_p11  ;;  %p2578_p2 = scmp.lt.u32.totalorder %s2576_s12, %s2571_s8 }
  0x17   : > { %p2580_p4 = scmp.lt.u32.totalorder %s2571_s8, %s2818_s4 }
  0x18   : > { %p2575_p0 = pneg %p2574_p13  ;;  %p2579_p3 = por %p2578_p2, %p2577_p1 }
  0x1a   : > { %p2581_p5 = por %p2580_p4, %p2579_p3 }
  0x1c   : > { %p2582_p6 = pnand %p2581_p5, %p2575_p0 }
  0x1e   : > { %2585 = shalt.err (!%p2582_p6)
}
  0x1f   : > { %s2586_s28 = scalar_lea.vmem %s2821_s6, 1024  ;;  %s2717_s29 = smov [#allocation4]  }
  0x20   : > { %p2587_p8 = scmp.ne.s32.totalorder %s2821_s6, %s2586_s28  ;;  %s2591_s30 = sshll.u32 %s2717_s29, 4  ;;  %s2592_s30 = int_to_ptr.vmem [resolvable:$false] %s2591_s30 }
  0x21   : > { %s2593_s5 = scalar_lea.vmem %s2592_s30, 2048  ;;  %p2594_p10 = scmp.lt.s32.totalorder %s2821_s6, %s2592_s30 }
  0x22   : > { %p2589_p11 = pnand %p2587_p8, %p2830_p12  ;;  %p2595_p7 = scmp.lt.s32.totalorder %s2593_s5, %s2586_s28 }
  0x24   : > { %p2590_p13 = pneg %p2589_p11  ;;  %p2596_p1 = por %p2595_p7, %p2594_p10 }
  0x26   : > { %p2597_p2 = pnand %p2596_p1, %p2590_p13 }
  0x28   : > { %2600 = shalt.err (!%p2597_p2)
}
  0x29   : > { %s2718_s8 = smov 128   ;;  %s2719_s10 = smov 8  }
  0x2a   : > { %2506 = dma.hbm_to_vmem [thread:$0]  (!%p2809_p9), %s2818_s4, 1024, %s2821_s6, %s2824_s7, %s2718_s8, %s2718_s8, %s2719_s10  }
  0x2b   : > { %p231_p7 = scmp.lt.s32.totalorder %s2715_s17, 3  ;;  %p3927_p10 = scmp.ge.s32.totalorder %s2715_s17, 1 }
  0x2c   : > { %s2868_s21 = scalar_lea.hbm %s3917_s0, %s2803_s25  ;;  %s165_s28 = scalar_lea.vmem [#allocation2], %s2807_s26 }
  0x2d   : > { %p2860_p0 = pnand %p3927_p10, %p231_p7  ;;  %s175_s29 = sshll.u32 %s165_s28, 4  ;;  %s2871_s29 = int_to_ptr.vmem [resolvable:$true] %s175_s29 }
  0x2e   : > { %s2875_s4 = scalar_lea.sflag [#allocation3], %s161_s24  ;;  %s2601_s6 = scalar_lea.hbm %s2868_s21, 1024 }
  0x2f   : > { %s3928_s11 = scalar_select %p2860_p0, 1, 0 }
  0x30   : > { %p2602_p3 = scmp.ne.s32.totalorder %s2868_s21, %s2601_s6  ;;  %s2606_s12 = scalar_lea.hbm %s3917_s0, 2048 }
  0x31   : > { %p2607_p6 = scmp.lt.u32.totalorder %s2868_s21, %s3917_s0  ;;  %p2608_p8 = scmp.lt.u32.totalorder %s2606_s12, %s2601_s6 }
  0x32   : > { %p2604_p4 = pnand %p2602_p3, %p2830_p12  ;;  %p2610_p13 = scmp.lt.u32.totalorder %s2601_s6, %s2868_s21 }
  0x33   : > { %p2609_p11 = por %p2608_p8, %p2607_p6 }
  0x34   : > { %p2605_p5 = pneg %p2604_p4 }
  0x35   : > { %p2611_p1 = por %p2610_p13, %p2609_p11 }
  0x37   : > { %p2612_p2 = pnand %p2611_p1, %p2605_p5 }
  0x39   : > { %2615 = shalt.err (!%p2612_p2)
}
  0x3a   : > { %s2616_s24 = scalar_lea.vmem %s2871_s29, 1024  ;;  %s2720_s28 = smov [#allocation2]  }
  0x3b   : > { %p2617_p7 = scmp.ne.s32.totalorder %s2871_s29, %s2616_s24  ;;  %s2621_s30 = sshll.u32 %s2720_s28, 4  ;;  %s2622_s30 = int_to_ptr.vmem [resolvable:$false] %s2621_s30 }
  0x3c   : > { %s2623_s18 = scalar_lea.vmem %s2622_s30, 2048  ;;  %p2624_p4 = scmp.lt.s32.totalorder %s2871_s29, %s2622_s30 }
  0x3d   : > { %p2619_p10 = pnand %p2617_p7, %p2830_p12  ;;  %p2625_p0 = scmp.lt.s32.totalorder %s2623_s18, %s2616_s24 }
  0x3f   : > { %p2620_p3 = pneg %p2619_p10  ;;  %p2626_p6 = por %p2625_p0, %p2624_p4 }
  0x41   : > { %p2627_p8 = pnand %p2626_p6, %p2620_p3 }
  0x43   : > { %2630 = shalt.err (!%p2627_p8)
}
  0x44   : > { %2503 = dma.hbm_to_vmem [thread:$0]  (!%p2809_p9), %s2868_s21, 1024, %s2871_s29, %s2875_s4, %s2718_s8, %s2718_s8, %s2719_s10  }
  0x45   : > { %s2906_s12 = scalar_lea.hbm %s3919_s2, %s2803_s25  ;;  %s213_s20 = scalar_lea.vmem [#allocation6], %s2807_s26 }
  0x46   : > { %s223_s24 = sshll.u32 %s213_s20, 4  ;;  %s2631_s28 = scalar_lea.hbm %s2906_s12, 1024  ;;  %s2909_s24 = int_to_ptr.vmem [resolvable:$true] %s223_s24 }
  0x47   : > { %p2632_p0 = scmp.ne.s32.totalorder %s2906_s12, %s2631_s28  ;;  %s2636_s29 = scalar_lea.hbm %s3919_s2, 2048 }
  0x48   : > { %p2637_p13 = scmp.lt.u32.totalorder %s2906_s12, %s3919_s2  ;;  %p2638_p1 = scmp.lt.u32.totalorder %s2636_s29, %s2631_s28 }
  0x49   : > { %p2634_p5 = pnand %p2632_p0, %p2830_p12  ;;  %p2640_p7 = scmp.lt.u32.totalorder %s2631_s28, %s2906_s12 }
  0x4a   : > { %p2639_p2 = por %p2638_p1, %p2637_p13 }
  0x4b   : > { %p2635_p11 = pneg %p2634_p5 }
  0x4c   : > { %p2641_p10 = por %p2640_p7, %p2639_p2 }
  0x4e   : > { %p2642_p3 = pnand %p2641_p10, %p2635_p11 }
  0x50   : > { %2645 = shalt.err (!%p2642_p3)
}
  0x51   : > { %s2646_s26 = scalar_lea.vmem %s2909_s24, 1024  ;;  %s2721_s18 = smov [#allocation6]  }
  0x52   : > { %p2647_p4 = scmp.ne.s32.totalorder %s2909_s24, %s2646_s26  ;;  %s2651_s6 = sshll.u32 %s2721_s18, 4  ;;  %s2652_s6 = int_to_ptr.vmem [resolvable:$false] %s2651_s6 }
  0x53   : > { %s2653_s5 = scalar_lea.vmem %s2652_s6, 2048  ;;  %p2654_p0 = scmp.lt.s32.totalorder %s2909_s24, %s2652_s6 }
  0x54   : > { %p2649_p6 = pnand %p2647_p4, %p2830_p12  ;;  %p2655_p5 = scmp.lt.s32.totalorder %s2653_s5, %s2646_s26 }
  0x56   : > { %p2650_p8 = pneg %p2649_p6  ;;  %p2656_p13 = por %p2655_p5, %p2654_p0 }
  0x58   : > { %p2657_p1 = pnand %p2656_p13, %p2650_p8 }
  0x5a   : > { %2660 = shalt.err (!%p2657_p1)
}
  0x5b   : > { %2509 = dma.hbm_to_vmem [thread:$0]  (!%p2809_p9), %s2906_s12, 1024, %s2909_s24, %s2824_s7, %s2718_s8, %s2718_s8, %s2719_s10  }
  0x5c   : > { %p3929_p12 = scmp.ne.s32.totalorder %s3928_s11, 0 }
  0x5d   : > { %s237_s9 = sand.u32 (!%p3929_p12), 1, %s2699_s13   ;;  %p3930_p11 = scmp.ne.s32.totalorder (!%p3929_p12), %s3924_s22, 0 }
  0x5e   : > { %235 = sbr.rel (%p3929_p12) target bundleno = 869 (0x365), region = 32  ;;  %s2483_s20 = sshll.u32 (!%p3929_p12), %s237_s9, 6 }
  0x5f   : > { %s238_s28 = scalar_lea.sflag (!%p3929_p12), [#allocation3], %s237_s9  ;;  %s2939_s30 = scalar_lea.vmem (!%p3929_p12), [#allocation2], %s2483_s20 }
  0x65   : > { %2686 = dma.done.wait (%p3930_p11), %s238_s28, 1024  }
  0x66   : > { %2688 = vsyncadd (%p3930_p11), %s238_s28, 4294966272  ;;  %s3931_s27 = sadd.s32 4294967295, %s2715_s17   ;;  %s2947_s8 = scalar_lea.vmem [#allocation4], %s2483_s20 }
  0x67   : > { %s246_s21 = sand.u32 1, %s3931_s27  }
  0x68   : > { %s247_s7 = scalar_lea.sflag [#allocation5], %s246_s21 }
  0x69   : > { %2690 = dma.done.wait (%p3930_p11), %s247_s7, 2048  }
  0x6a   : > { %2692 = vsyncadd (%p3930_p11), %s247_s7, 4294965248  ;;  %v312_v0 = vld [vmem:[%s2939_s30 + $0x8] sm:$0xff]  ;;  %s2955_s10 = scalar_lea.vmem [#allocation6], %s2483_s20  ;;  %v314_v4 = vld [vmem:[%s2939_s30 + $0x18] sm:$0xff]  ;;  %v3923_v7 = vlaneseq  ;;  %v2722_v13 = vmov 1983009808  }
  0x6b   : > { %v320_v1 = vld [vmem:[%s2947_s8 + $0x8] sm:$0xff]  ;;  %v322_v5 = vld [vmem:[%s2947_s8 + $0x18] sm:$0xff]  ;;  %v442_v14 = vunpack.c.l.s4 %v2722_v13  ;;  %vm359_vm0 = vcmask 1046528   ;;  %v315_v21 = vld [vmem:[%s2939_s30 + $0x20] sm:$0xff]  ;;  %vm608_vm1 = vcmask 123904   ;;  %vm893_vm2 = vcmask 1042434  }
  0x6c   : > { %v336_v2 = vld [vmem:[%s2955_s10 + $0x8] sm:$0xff]  ;;  %v328_v3 = vmax.f32 %v312_v0, %v320_v1  ;;  %v338_v6 = vld [vmem:[%s2955_s10 + $0x18] sm:$0xff]  ;;  %v330_v8 = vmax.f32 %v314_v4, %v322_v5  ;;  %v323_v22 = vld [vmem:[%s2947_s8 + $0x20] sm:$0xff]  ;;  %v2979_v30 = vshrl.u32 %v3923_v7, 7  ;;  %vm895_vm3 = vcmask 1043459   ;;  %s2723_s22 = smov 127  }
  0x6d   : > { %v316_v9 = vld [vmem:[%s2939_s30 + $0x28] sm:$0xff]  ;;  %v318_v16 = vld [vmem:[%s2939_s30 + $0x38] sm:$0xff]  ;;  %v339_v23 = vld [vmem:[%s2955_s10 + $0x20] sm:$0xff]  ;;  %v331_v26 = vmax.f32 %v315_v21, %v323_v22  ;;  %v443_v35 = vunpack.c.0.s8 %v442_v14  ;;  %vm897_vm4 = vcmask 1044484   ;;  %vm899_vm5 = vcmask 1045509   ;;  %p301_p9 = scmp.lt.s32.totalorder %s2707_s15, 1 }
  0x6e   : > { %v324_v10 = vld [vmem:[%s2947_s8 + $0x28] sm:$0xff]  ;;  %v2964_v12 = vmax.f32 %v328_v3, %v336_v2  ;;  %v326_v17 = vld [vmem:[%s2947_s8 + $0x38] sm:$0xff]  ;;  %v2969_v19 = vmax.f32 %v330_v8, %v338_v6  ;;  %v317_v27 = vld [vmem:[%s2939_s30 + $0x30] sm:$0xff]  ;;  %vm901_vm6 = vcmask 1046534   ;;  %vm903_vm7 = vcmask 1047559   ;;  %s2725_s4 = smov 126  }
  0x6f   : > { %v340_v11 = vld [vmem:[%s2955_s10 + $0x28] sm:$0xff]  ;;  %v332_v15 = vmax.f32 %v316_v9, %v324_v10  ;;  %v342_v18 = vld [vmem:[%s2955_s10 + $0x38] sm:$0xff]  ;;  %v334_v20 = vmax.f32 %v318_v16, %v326_v17  ;;  %v325_v28 = vld [vmem:[%s2947_s8 + $0x30] sm:$0xff]  ;;  %v347_v37 = vmax.f32 %v331_v26, %v339_v23  ;;  %v3012_v58 = vsub.s32 %v443_v35, %v2979_v30  ;;  %s3950_s15 = smov (!%p301_p9, %s2707_s15), 1  ;;  %s2726_s25 = smov 116  }
  0x70   : > { %v361_v24 = vrot.slane %v2964_v12, 1  ;;  %v341_v29 = vld [vmem:[%s2955_s10 + $0x30] sm:$0xff]  ;;  %v364_v31 = vrot.slane %v2969_v19, 1  ;;  %v333_v33 = vmax.f32 %v317_v27, %v325_v28  ;;  %vm931_vm8 = vcmask 1040384   ;;  %s2493_s11 = sshll.u32 %s3950_s15, 6  ;;  %s2724_s15 = smov 118  }
  0x71   : > { %v348_v25 = vmax.f32 %v332_v15, %v340_v11  ;;  %v350_v32 = vmax.f32 %v334_v20, %v342_v18  ;;  %v366_v44 = vrot.slane %v347_v37, 1  ;;  %v847_v45 = vsel %vm608_vm1, %v347_v37, -inf  ;;  %s3248_s29 = scalar_lea.vmem %s3920_s3, %s2493_s11  ;;  %s2727_s26 = smov 124  }
  0x72   : > { %v380_v34 = vsel %vm359_vm0, %v361_v24, -inf  ;;  %v381_v39 = vsel %vm359_vm0, %v364_v31, -inf  ;;  %v2991_v41 = vmax.f32 %v333_v33, %v341_v29  ;;  %v848_v49 = vrot.slane %v847_v45, 4  ;;  %s2728_s18 = smov 114   ;;  %s2729_s6 = smov 122  }
  0x73   : > { %v367_v36 = vrot.slane %v348_v25, 1  ;;  %v2986_v38 = vmax.f32 %v2964_v12, %v380_v34  ;;  %v370_v40 = vrot.slane %v350_v32, 1  ;;  %v2994_v42 = vmax.f32 %v2969_v19, %v381_v39  ;;  %s2730_s5 = smov 120  }
  0x74   : > { %v369_v56 = vrot.slane %v2991_v41, 1  ;;  %v3022_v0 = vmax.f32 %v847_v45, %v848_v49  ;;  %vm2057_vm9 = vcmask 8192   ;;  %vm1945_vm10 = vcmask 15360  }
  0x75   : > { %v382_v43 = vsel %vm359_vm0, %v367_v36, -inf  ;;  %v401_v46 = vrot.slane %v2986_v38, 1  ;;  %v383_v48 = vsel %vm359_vm0, %v370_v40, -inf  ;;  %v404_v50 = vrot.slane %v2994_v42, 1 }
  0x76   : > { %v389_v47 = vmax.f32 %v348_v25, %v382_v43  ;;  %v3001_v51 = vmax.f32 %v350_v32, %v383_v48  ;;  %v368_v52 = vsel %vm359_vm0, %v366_v44, %v367_v36  ;;  %v3034_v8 = vsel %vm359_vm0, %v369_v56, %v370_v40 }
  0x77   : > { %v420_v53 = vsel %vm359_vm0, %v401_v46, -inf  ;;  %v388_v55 = vmax.f32 %v347_v37, %v368_v52  ;;  %v421_v59 = vsel %vm359_vm0, %v404_v50, -inf  ;;  %v850_v17 = vrot.slane %v3022_v0, 2 }
  0x78   : > { %v407_v54 = vrot.slane %v389_v47, 1  ;;  %v3009_v57 = vmax.f32 %v2986_v38, %v420_v53  ;;  %v410_v60 = vrot.slane %v3001_v51, 1  ;;  %v3019_v61 = vmax.f32 %v2994_v42, %v421_v59 }
  0x79   : > { %v406_v63 = vrot.slane %v388_v55, 1  ;;  %vm964_vm11 = vcmask 121856   ;;  %vm2081_vm12 = vcmask 0   ;;  %vm2079_vm13 = vcmask 7168  }
  0x7a   : > { %v422_v62 = vsel %vm359_vm0, %v407_v54, -inf  ;;  %v457_v1 = vcombine.high %v3009_v57, %v3009_v57  ;;  %v423_v3 = vsel %vm359_vm0, %v410_v60, -inf  ;;  %v491_v4 = vcombine.high %v3019_v61, %v3019_v61 }
  0x7b   : > { %v429_v2 = vmax.f32 %v389_v47, %v422_v62  ;;  %v431_v5 = vmax.f32 %v3001_v51, %v423_v3  ;;  %v408_v6 = vsel %vm359_vm0, %v406_v63, %v407_v54  ;;  %vm2311_vm14 = vcmask 65544  }
  0x7c   : > { %v3037_v9 = vrot.slane %v457_v1, %v3012_v58  ;;  %v428_v13 = vmax.f32 %v388_v55, %v408_v6  ;;  %v3043_v14 = vrot.slane %v491_v4, %v3012_v58  ;;  %vm2272_vm15 = vcmask 1041409  }
  0x7d   : > { %v525_v10 = vcombine.high %v429_v2, %v429_v2  ;;  %v3040_v11 = vrot.slane %v429_v2, %v3012_v58  ;;  %v559_v15 = vcombine.high %v431_v5, %v431_v5  ;;  %v3046_v16 = vrot.slane %v431_v5, %v3012_v58 }
  0x7e   : > { %v473_v18 = vcombine.high %v3037_v9, %v3037_v9  ;;  %v508_v21 = vcombine.high %v428_v13, %v428_v13  ;;  %v515_v22 = vrot.slane %v428_v13, %v3012_v58  ;;  %v507_v23 = vcombine.high %v3043_v14, %v3043_v14 }
  0x7f   : > { %v3052_v20 = vrot.slane %v525_v10, %v3012_v58  ;;  %v3058_v25 = vrot.slane %v559_v15, %v3012_v58  ;;  %v540_v26 = vcombine.high %v3040_v11, %v3040_v11  ;;  %v3064_v27 = vsel %vm608_vm1, %v3040_v11, -inf }
  0x80   : > { %v658_v28 = vsel %vm608_vm1, %v473_v18, -inf  ;;  %v522_v32 = vrot.slane %v508_v21, %v3012_v58  ;;  %v523_v33 = vcombine.high %v515_v22, %v515_v22  ;;  %v714_v35 = vsel %vm608_vm1, %v507_v23, -inf }
  0x81   : > { %v541_v29 = vcombine.high %v3052_v20, %v3052_v20  ;;  %v659_v34 = vrot.slane %v658_v28, 4  ;;  %v575_v36 = vcombine.high %v3058_v25, %v3058_v25  ;;  %v721_v37 = vsel %vm608_vm1, %v515_v22, -inf }
  0x82   : > { %v715_v39 = vrot.slane %v714_v35, 4  ;;  %v524_v43 = vcombine.high %v522_v32, %v522_v32  ;;  %v722_v44 = vrot.slane %v721_v37, 4  ;;  %v728_v49 = vsel %vm608_vm1, %v523_v33, -inf }
  0x83   : > { %v770_v40 = vsel %vm608_vm1, %v541_v29, -inf  ;;  %v660_v45 = vmax.f32 %v658_v28, %v659_v34  ;;  %v826_v48 = vsel %vm608_vm1, %v575_v36, -inf  ;;  %v729_v55 = vrot.slane %v728_v49, 4 }
  0x84   : > { %v771_v47 = vrot.slane %v770_v40, 4  ;;  %v716_v52 = vmax.f32 %v714_v35, %v715_v39  ;;  %v827_v53 = vrot.slane %v826_v48, 4  ;;  %v723_v54 = vmax.f32 %v721_v37, %v722_v44 }
  0x85   : > { %v661_v56 = vrot.slane %v660_v45, 2  ;;  %v735_v62 = vsel %vm608_vm1, %v522_v32, -inf  ;;  %v742_v63 = vsel %vm608_vm1, %v524_v43, -inf  ;;  %v730_v4 = vmax.f32 %v728_v49, %v729_v55 }
  0x86   : > { %v772_v59 = vmax.f32 %v770_v40, %v771_v47  ;;  %v717_v1 = vrot.slane %v716_v52, 2  ;;  %v828_v2 = vmax.f32 %v826_v48, %v827_v53  ;;  %v724_v3 = vrot.slane %v723_v54, 2 }
  0x87   : > { %v662_v5 = vmax.f32 %v660_v45, %v661_v56  ;;  %v736_v10 = vrot.slane %v735_v62, 4  ;;  %v743_v13 = vrot.slane %v742_v63, 4  ;;  %v731_v22 = vrot.slane %v730_v4, 2 }
  0x88   : > { %v773_v6 = vrot.slane %v772_v59, 2  ;;  %v718_v15 = vmax.f32 %v716_v52, %v717_v1  ;;  %v829_v18 = vrot.slane %v828_v2, 2  ;;  %v725_v21 = vmax.f32 %v723_v54, %v724_v3  ;;  %v3103_v1 = vld [vmem:[%s2947_s8] sm:$0xff] }
  0x89   : > { %v663_v23 = vrot.slane %v662_v5, 1  ;;  %v737_v29 = vmax.f32 %v735_v62, %v736_v10  ;;  %v744_v32 = vmax.f32 %v742_v63, %v743_v13  ;;  %v732_v36 = vmax.f32 %v730_v4, %v731_v22  ;;  %v3100_v63 = vld [vmem:[%s2939_s30] sm:$0xff] }
  0x8a   : > { %v774_v28 = vmax.f32 %v772_v59, %v773_v6  ;;  %v719_v33 = vrot.slane %v718_v15, 1  ;;  %v830_v34 = vmax.f32 %v828_v2, %v829_v18  ;;  %v726_v35 = vrot.slane %v725_v21, 1 }
  0x8b   : > { %v3079_v37 = vmax.f32 %v662_v5, %v663_v23  ;;  %v738_v40 = vrot.slane %v737_v29, 2  ;;  %v745_v43 = vrot.slane %v744_v32, 2  ;;  %v733_v48 = vrot.slane %v732_v36, 1 }
  0x8c   : > { %v775_v39 = vrot.slane %v774_v28, 1  ;;  %v3081_v44 = vmax.f32 %v718_v15, %v719_v33  ;;  %v831_v45 = vrot.slane %v830_v34, 1  ;;  %v727_v47 = vmax.f32 %v725_v21, %v726_v35 }
  0x8d   : > { %942 = vrot.lane.b32.xlu0 %v3079_v37, %s2723_s22  ;;  %v739_v52 = vmax.f32 %v737_v29, %v738_v40  ;;  %v746_v53 = vmax.f32 %v744_v32, %v745_v43  ;;  %v851_v54 = vmax.f32 %v3022_v0, %v850_v17  ;;  %v734_v56 = vmax.f32 %v732_v36, %v733_v48 }
  0x8e   : > { %v3085_v49 = vmax.f32 %v774_v28, %v775_v39  ;;  %946 = vrot.lane.b32.xlu1 %v3081_v44, %s2723_s22  ;;  %v3092_v55 = vmax.f32 %v830_v34, %v831_v45  ;;  %v750_v59 = vrot.slane %v3064_v27, 4  ;;  %v756_v62 = vsel %vm608_vm1, %v540_v26, -inf }
  0x8f   : > { %v740_v2 = vrot.slane %v739_v52, 1  ;;  %v747_v3 = vrot.slane %v746_v53, 1  ;;  %v757_v0 = vrot.slane %v756_v62, 4  ;;  %v763_v17 = vsel %vm608_vm1, %v3052_v20, -inf }
  0x90   : > { %v751_v4 = vmax.f32 %v3064_v27, %v750_v59  ;;  %v764_v5 = vrot.slane %v763_v17, 4  ;;  %v911_v6 = vsel %vm893_vm2, %v734_v56, %v727_v47  ;;  %v327_v13 = vmax.f32 %v3100_v63, %v3103_v1 }
  0x91   : > { %950 = vrot.lane.b32.xlu0 %v3085_v49, %s2723_s22  ;;  %v741_v11 = vmax.f32 %v739_v52, %v740_v2  ;;  %v748_v26 = vmax.f32 %v746_v53, %v747_v3  ;;  %v758_v10 = vmax.f32 %v756_v62, %v757_v0  ;;  %v852_v27 = vrot.slane %v851_v54, 1 }
  0x92   : > { %954 = vrot.lane.b32.xlu1 %v3092_v55, %s2723_s22  ;;  %v752_v20 = vrot.slane %v751_v4, 2  ;;  %v765_v15 = vmax.f32 %v763_v17, %v764_v5  ;;  %v390_v18 = vmax.f32 %v2991_v41, %v3034_v8  ;;  %v574_v23 = vcombine.high %v3046_v16, %v3046_v16 }
  0x93   : > { %v759_v21 = vrot.slane %v758_v10, 2  ;;  %v912_v22 = vsel %vm895_vm3, %v741_v11, %v911_v6  ;;  %v805_v28 = vsel %vm608_vm1, %v3046_v16, -inf  ;;  %v819_v8 = vsel %vm608_vm1, %v3058_v25, -inf }
  0x94   : > { %v753_v29 = vmax.f32 %v751_v4, %v752_v20  ;;  %v766_v32 = vrot.slane %v765_v15, 2  ;;  %v913_v33 = vsel %vm897_vm4, %v748_v26, %v912_v22  ;;  %v409_v34 = vrot.slane %v390_v18, 1 }
  0x95   : > { %v760_v35 = vmax.f32 %v758_v10, %v759_v21  ;;  %v806_v36 = vrot.slane %v805_v28, 4  ;;  %v812_v39 = vsel %vm608_vm1, %v574_v23, -inf  ;;  %v820_v53 = vrot.slane %v819_v8, 4 }
  0x96   : > { %v754_v40 = vrot.slane %v753_v29, 1  ;;  %v767_v43 = vmax.f32 %v765_v15, %v766_v32  ;;  %v411_v45 = vsel %vm359_vm0, %v409_v34, %v410_v60  ;;  %v813_v47 = vrot.slane %v812_v39, 4 }
  0x97   : > { %v761_v16 = vrot.slane %v760_v35, 1  ;;  %v430_v48 = vmax.f32 %v390_v18, %v411_v45  ;;  %v807_v52 = vmax.f32 %v805_v28, %v806_v36  ;;  %v853_v62 = vmax.f32 %v851_v54, %v852_v27  ;;  %v335_v45 = vld [vmem:[%s2955_s10] sm:$0xff] }
  0x98   : > { %v755_v56 = vmax.f32 %v753_v29, %v754_v40  ;;  %v768_v59 = vrot.slane %v767_v43, 1  ;;  %v814_v2 = vmax.f32 %v812_v39, %v813_v47  ;;  %v821_v6 = vmax.f32 %v819_v8, %v820_v53 }
  0x99   : > { %v762_v3 = vmax.f32 %v760_v35, %v761_v16  ;;  %v542_v0 = vcombine.high %v430_v48, %v430_v48  ;;  %v549_v17 = vrot.slane %v430_v48, %v3012_v58  ;;  %v808_v25 = vrot.slane %v807_v52, 2 }
  0x9a   : > { %v769_v4 = vmax.f32 %v767_v43, %v768_v59  ;;  %v914_v5 = vsel %vm899_vm5, %v755_v56, %v913_v33  ;;  %v815_v51 = vrot.slane %v814_v2, 2  ;;  %v854_v27 = vsel %vm608_vm1, %v2991_v41, -inf }
  0x9b   : > { %v915_v60 = vsel %vm901_vm6, %v762_v3, %v914_v5  ;;  %v556_v11 = vrot.slane %v542_v0, %v3012_v58  ;;  %v557_v26 = vcombine.high %v549_v17, %v549_v17  ;;  %v777_v10 = vsel %vm608_vm1, %v549_v17, -inf }
  0x9c   : > { %v916_v54 = vsel %vm903_vm7, %v769_v4, %v915_v60  ;;  %v778_v20 = vrot.slane %v777_v10, 4  ;;  %v809_v15 = vmax.f32 %v807_v52, %v808_v25  ;;  %v816_v33 = vmax.f32 %v814_v2, %v815_v51 }
  0x9d   : > { %v3138_v18 = vsel %vm931_vm8, %v853_v62, %v916_v54  ;;  %v558_v21 = vcombine.high %v556_v11, %v556_v11  ;;  %v784_v22 = vsel %vm608_vm1, %v557_v26, -inf  ;;  %v791_v23 = vsel %vm608_vm1, %v556_v11, -inf }
  0x9e   : > { %948 = vrot.lane.b32.xlu1 %v3138_v18, %s2723_s22  ;;  %v779_v28 = vmax.f32 %v777_v10, %v778_v20  ;;  %v785_v29 = vrot.slane %v784_v22, 4  ;;  %v792_v32 = vrot.slane %v791_v23, 4  ;;  %v810_v35 = vrot.slane %v809_v15, 1 }
  0x9f   : > { %v798_v34 = vsel %vm608_vm1, %v558_v21, -inf  ;;  %v822_v41 = vrot.slane %v821_v6, 2  ;;  %v855_v36 = vrot.slane %v854_v27, 4  ;;  %v464_v47 = vrot.slane %v3009_v57, %v3012_v58 }
  0xa0   : > { %v780_v39 = vrot.slane %v779_v28, 2  ;;  %v786_v8 = vmax.f32 %v784_v22, %v785_v29  ;;  %v793_v40 = vmax.f32 %v791_v23, %v792_v32  ;;  %v799_v43 = vrot.slane %v798_v34, 4 }
  0xa1   : > { %v823_v16 = vmax.f32 %v821_v6, %v822_v41  ;;  %v856_v48 = vmax.f32 %v854_v27, %v855_v36  ;;  %v811_v62 = vmax.f32 %v809_v15, %v810_v35  ;;  %v817_v2 = vrot.slane %v816_v33, 1 }
  0xa2   : > { %v781_v52 = vmax.f32 %v779_v28, %v780_v39  ;;  %v787_v53 = vrot.slane %v786_v8, 2  ;;  %v794_v56 = vrot.slane %v793_v40, 2  ;;  %v800_v59 = vmax.f32 %v798_v34, %v799_v43 }
  0xa3   : > { %v857_v3 = vrot.slane %v856_v48, 2  ;;  %v343_v0 = vmax.f32 %v327_v13, %v335_v45  ;;  %v824_v51 = vrot.slane %v823_v16, 1  ;;  %v472_v60 = vcombine.high %v464_v47, %v464_v47 }
  0xa4   : > { %v782_v17 = vrot.slane %v781_v52, 1  ;;  %v788_v25 = vmax.f32 %v786_v8, %v787_v53  ;;  %v795_v4 = vmax.f32 %v793_v40, %v794_v56  ;;  %v801_v5 = vrot.slane %v800_v59, 2  ;;  %v313_v53 = vld [vmem:[%s2939_s30 + $0x10] sm:$0xff] }
  0xa5   : > { %v858_v57 = vmax.f32 %v856_v48, %v857_v3  ;;  %v360_v6 = vrot.slane %v343_v0, 1  ;;  %v637_v63 = vsel %vm608_vm1, %v464_v47, -inf  ;;  %v644_v1 = vsel %vm608_vm1, %v472_v60, -inf  ;;  %v321_v56 = vld [vmem:[%s2947_s8 + $0x10] sm:$0xff] }
  0xa6   : > { %v783_v11 = vmax.f32 %v781_v52, %v782_v17  ;;  %v789_v26 = vrot.slane %v788_v25, 1  ;;  %v796_v10 = vrot.slane %v795_v4, 1  ;;  %v802_v54 = vmax.f32 %v800_v59, %v801_v5 }
  0xa7   : > { %v859_v20 = vrot.slane %v858_v57, 1  ;;  %v362_v15 = vsel %vm359_vm0, %v360_v6, %v361_v24  ;;  %v818_v23 = vmax.f32 %v816_v33, %v817_v2  ;;  %v638_v28 = vrot.slane %v637_v63, 4 }
  0xa8   : > { %v790_v13 = vmax.f32 %v788_v25, %v789_v26  ;;  %v797_v27 = vmax.f32 %v795_v4, %v796_v10  ;;  %v803_v21 = vrot.slane %v802_v54, 1  ;;  %v384_v22 = vmax.f32 %v343_v0, %v362_v15 }
  0xa9   : > { %v645_v29 = vrot.slane %v644_v1, 4  ;;  %v651_v32 = vsel %vm608_vm1, %v3037_v9, -inf  ;;  %v825_v41 = vmax.f32 %v823_v16, %v824_v51  ;;  %v860_v36 = vmax.f32 %v858_v57, %v859_v20 }
  0xaa   : > { %v804_v34 = vmax.f32 %v802_v54, %v803_v21  ;;  %v917_v35 = vsel %vm893_vm2, %v790_v13, %v783_v11  ;;  %v400_v12 = vrot.slane %v384_v22, 1  ;;  %v652_v24 = vrot.slane %v651_v32, 4  ;;  %v337_v11 = vld [vmem:[%s2955_s10 + $0x10] sm:$0xff] }
  0xab   : > { %v918_v39 = vsel %vm895_vm3, %v797_v27, %v917_v35  ;;  %v639_v8 = vmax.f32 %v637_v63, %v638_v28  ;;  %v646_v43 = vmax.f32 %v644_v1, %v645_v29  ;;  %v833_v9 = vsel %vm608_vm1, %v343_v0, -inf }
  0xac   : > { %v919_v40 = vsel %vm897_vm4, %v804_v34, %v918_v39  ;;  %v402_v33 = vsel %vm359_vm0, %v400_v12, %v401_v46  ;;  %v2058_v45 = vsel %vm2057_vm9, %v3079_v37, -inf  ;;  %v653_v52 = vmax.f32 %v651_v32, %v652_v24 }
  0xad   : > { %v920_v47 = vsel %vm899_vm5, %v811_v62, %v919_v40  ;;  %v424_v48 = vmax.f32 %v384_v22, %v402_v33  ;;  %v834_v46 = vrot.slane %v833_v9, 4  ;;  %v2064_v3 = vsel %vm2057_vm9, %v3081_v44, -inf }
  0xae   : > { %v921_v16 = vsel %vm901_vm6, %v818_v23, %v920_v47  ;;  %v640_v62 = vrot.slane %v639_v8, 2  ;;  %v647_v17 = vrot.slane %v646_v43, 2  ;;  %v329_v51 = vmax.f32 %v313_v53, %v321_v56 }
  0xaf   : > { %v922_v59 = vsel %vm903_vm7, %v825_v41, %v921_v16  ;;  %v440_v2 = vcombine.high %v424_v48, %v424_v48  ;;  %v447_v38 = vrot.slane %v424_v48, %v3012_v58  ;;  %v498_v57 = vrot.slane %v3019_v61, %v3012_v58 }
  0xb0   : > { %2059 = vmax.xlane.f32.xlu0 %v2058_v45  ;;  %v3176_v0 = vsel %vm931_vm8, %v860_v36, %v922_v59  ;;  %v654_v60 = vrot.slane %v653_v52, 2  ;;  %v835_v20 = vmax.f32 %v833_v9, %v834_v46  ;;  %v2070_v15 = vsel %vm2057_vm9, %v3085_v49, -inf }
  0xb1   : > { %952 = vrot.lane.b32.xlu1 %v3176_v0, %s2723_s22  ;;  %v454_v25 = vrot.slane %v440_v2, %v3012_v58  ;;  %v455_v4 = vcombine.high %v447_v38, %v447_v38  ;;  %v609_v5 = vsel %vm608_vm1, %v447_v38, -inf  ;;  %v641_v21 = vmax.f32 %v639_v8, %v640_v62 }
  0xb2   : > { %v610_v6 = vrot.slane %v609_v5, 4  ;;  %v648_v61 = vmax.f32 %v646_v43, %v647_v17  ;;  %v345_v22 = vmax.f32 %v329_v51, %v337_v11  ;;  %v655_v34 = vmax.f32 %v653_v52, %v654_v60 }
  0xb3   : > { %v456_v26 = vcombine.high %v454_v25, %v454_v25  ;;  %v616_v10 = vsel %vm608_vm1, %v455_v4, -inf  ;;  %v623_v54 = vsel %vm608_vm1, %v454_v25, -inf  ;;  %v836_v35 = vrot.slane %v835_v20, 2 }
  0xb4   : > { %2065 = vmax.xlane.f32.xlu0 %v2064_v3  ;;  %v611_v63 = vmax.f32 %v609_v5, %v610_v6  ;;  %v617_v1 = vrot.slane %v616_v10, 4  ;;  %v624_v13 = vrot.slane %v623_v54, 4  ;;  %v363_v12 = vrot.slane %v345_v22, 1 }
  0xb5   : > { %v630_v27 = vsel %vm608_vm1, %v456_v26, -inf  ;;  %v506_v24 = vcombine.high %v498_v57, %v498_v57  ;;  %v642_v33 = vrot.slane %v641_v21, 1  ;;  %v693_v43 = vsel %vm608_vm1, %v498_v57, -inf }
  0xb6   : > { %v612_v23 = vrot.slane %v611_v63, 2  ;;  %v618_v28 = vmax.f32 %v616_v10, %v617_v1  ;;  %v625_v29 = vmax.f32 %v623_v54, %v624_v13  ;;  %v631_v32 = vrot.slane %v630_v27, 4 }
  0xb7   : > { %v365_v8 = vsel %vm359_vm0, %v363_v12, %v364_v31  ;;  %v700_v9 = vsel %vm608_vm1, %v506_v24, -inf  ;;  %v649_v52 = vrot.slane %v648_v61, 1  ;;  %v656_v53 = vrot.slane %v655_v34, 1 }
  0xb8   : > { %2071 = vmax.xlane.f32.xlu0 %v2070_v15  ;;  %v613_v41 = vmax.f32 %v611_v63, %v612_v23  ;;  %v619_v36 = vrot.slane %v618_v28, 2  ;;  %v626_v39 = vrot.slane %v625_v29, 2  ;;  %v632_v40 = vmax.f32 %v630_v27, %v631_v32 }
  0xb9   : > { %v386_v56 = vmax.f32 %v345_v22, %v365_v8  ;;  %v707_v59 = vsel %vm608_vm1, %v3043_v14, -inf  ;;  %v837_v3 = vmax.f32 %v835_v20, %v836_v35  ;;  %v694_v62 = vrot.slane %v693_v43, 4 }
  0xba   : > { %v614_v45 = vrot.slane %v613_v41, 1  ;;  %v620_v47 = vmax.f32 %v618_v28, %v619_v36  ;;  %v627_v48 = vmax.f32 %v625_v29, %v626_v39  ;;  %v633_v16 = vrot.slane %v632_v40, 2 }
  0xbb   : > { %v403_v31 = vrot.slane %v386_v56, 1  ;;  %v701_v17 = vrot.slane %v700_v9, 4  ;;  %v840_v51 = vsel %vm608_vm1, %v345_v22, -inf  ;;  %v643_v57 = vmax.f32 %v641_v21, %v642_v33 }
  0xbc   : > { %v615_v2 = vmax.f32 %v613_v41, %v614_v45  ;;  %v621_v38 = vrot.slane %v620_v47, 1  ;;  %v628_v46 = vrot.slane %v627_v48, 1  ;;  %v634_v19 = vmax.f32 %v632_v40, %v633_v16 }
  0xbd   : > { %v650_v6 = vmax.f32 %v648_v61, %v649_v52  ;;  %v405_v60 = vsel %vm359_vm0, %v403_v31, %v404_v50  ;;  %v708_v14 = vrot.slane %v707_v59, 4  ;;  %v841_v54 = vrot.slane %v840_v51, 4 }
  0xbe   : > { %v622_v25 = vmax.f32 %v620_v47, %v621_v38  ;;  %v629_v4 = vmax.f32 %v627_v48, %v628_v46  ;;  %v635_v5 = vrot.slane %v634_v19, 1  ;;  %v426_v10 = vmax.f32 %v386_v56, %v405_v60 }
  0xbf   : > { %v657_v20 = vmax.f32 %v655_v34, %v656_v53  ;;  %v838_v15 = vrot.slane %v837_v3, 1  ;;  %v695_v1 = vmax.f32 %v693_v43, %v694_v62  ;;  %v702_v61 = vmax.f32 %v700_v9, %v701_v17 }
  0xc0   : > { %v636_v11 = vmax.f32 %v634_v19, %v635_v5  ;;  %v894_v26 = vsel %vm893_vm2, %v622_v25, %v615_v2  ;;  %v474_v27 = vcombine.high %v426_v10, %v426_v10  ;;  %v481_v21 = vrot.slane %v426_v10, %v3012_v58 }
  0xc1   : > { %v896_v63 = vsel %vm895_vm3, %v629_v4, %v894_v26  ;;  %v709_v50 = vmax.f32 %v707_v59, %v708_v14  ;;  %v842_v22 = vmax.f32 %v840_v51, %v841_v54  ;;  %v839_v34 = vmax.f32 %v837_v3, %v838_v15 }
  0xc2   : > { %v898_v13 = vsel %vm897_vm4, %v636_v11, %v896_v63  ;;  %v488_v28 = vrot.slane %v474_v27, %v3012_v58  ;;  %v489_v29 = vcombine.high %v481_v21, %v481_v21  ;;  %v665_v32 = vsel %vm608_vm1, %v481_v21, -inf }
  0xc3   : > { %v900_v42 = vsel %vm899_vm5, %v643_v57, %v898_v13  ;;  %v666_v12 = vrot.slane %v665_v32, 4  ;;  %v696_v24 = vrot.slane %v695_v1, 2  ;;  %v703_v40 = vrot.slane %v702_v61, 2 }
  0xc4   : > { %v902_v23 = vsel %vm901_vm6, %v650_v6, %v900_v42  ;;  %v490_v41 = vcombine.high %v488_v28, %v488_v28  ;;  %v672_v36 = vsel %vm608_vm1, %v489_v29, -inf  ;;  %v679_v39 = vsel %vm608_vm1, %v488_v28, -inf }
  0xc5   : > { %v904_v35 = vsel %vm903_vm7, %v657_v20, %v902_v23  ;;  %v667_v33 = vmax.f32 %v665_v32, %v666_v12  ;;  %v673_v8 = vrot.slane %v672_v36, 4  ;;  %v680_v43 = vrot.slane %v679_v39, 4 }
  0xc6   : > { %v686_v9 = vsel %vm608_vm1, %v490_v41, -inf  ;;  %v710_v45 = vrot.slane %v709_v50, 2  ;;  %v843_v47 = vrot.slane %v842_v22, 2  ;;  %v3214_v56 = vsel %vm931_vm8, %v839_v34, %v904_v35 }
  0xc7   : > { %v668_v48 = vrot.slane %v667_v33, 2  ;;  %v674_v16 = vmax.f32 %v672_v36, %v673_v8  ;;  %v681_v52 = vmax.f32 %v679_v39, %v680_v43  ;;  %v687_v53 = vrot.slane %v686_v9, 4 }
  0xc8   : > { %v697_v59 = vmax.f32 %v695_v1, %v696_v24  ;;  %v704_v2 = vmax.f32 %v702_v61, %v703_v40  ;;  %v711_v31 = vmax.f32 %v709_v50, %v710_v45  ;;  %v844_v62 = vmax.f32 %v842_v22, %v843_v47 }
  0xc9   : > { %v669_v38 = vmax.f32 %v667_v33, %v668_v48  ;;  %v675_v46 = vrot.slane %v674_v16, 2  ;;  %v682_v19 = vrot.slane %v681_v52, 2  ;;  %v688_v3 = vmax.f32 %v686_v9, %v687_v53 }
  0xca   : > { %v698_v51 = vrot.slane %v697_v59, 1  ;;  %v705_v57 = vrot.slane %v704_v2, 1  ;;  %v712_v26 = vrot.slane %v711_v31, 1  ;;  %v845_v15 = vrot.slane %v844_v62, 1 }
  0xcb   : > { %v670_v17 = vrot.slane %v669_v38, 1  ;;  %v676_v25 = vmax.f32 %v674_v16, %v675_v46  ;;  %v683_v4 = vmax.f32 %v681_v52, %v682_v19  ;;  %v689_v5 = vrot.slane %v688_v3, 2 }
  0xcc   : > { %v699_v63 = vmax.f32 %v697_v59, %v698_v51  ;;  %v2054_v1 = vsel %vm1945_vm10, %v3214_v56, -inf  ;;  %v706_v27 = vmax.f32 %v704_v2, %v705_v57  ;;  %v713_v61 = vmax.f32 %v711_v31, %v712_v26 }
  0xcd   : > { %v671_v6 = vmax.f32 %v669_v38, %v670_v17  ;;  %v677_v60 = vrot.slane %v676_v25, 1  ;;  %v684_v14 = vrot.slane %v683_v4, 1  ;;  %v690_v11 = vmax.f32 %v688_v3, %v689_v5 }
  0xce   : > { %940 = vrot.lane.b32.xlu0 %v3214_v56, %s2723_s22  ;;  %v846_v50 = vmax.f32 %v844_v62, %v845_v15  ;;  %v2067_v35 = vsel %vm1945_vm10, %v3138_v18, -inf  ;;  %vm2309_vm0 = vcmask 72712  }
  0xcf   : > { %v678_v10 = vmax.f32 %v676_v25, %v677_v60  ;;  %v685_v54 = vmax.f32 %v683_v4, %v684_v14  ;;  %v691_v20 = vrot.slane %v690_v11, 1 }
  0xd1   : > { %v692_v13 = vmax.f32 %v690_v11, %v691_v20  ;;  %v905_v21 = vsel %vm893_vm2, %v678_v10, %v671_v6 }
  0xd2   : > { %v906_v42 = vsel %vm895_vm3, %v685_v54, %v905_v21 }
  0xd3   : > { %v907_v22 = vsel %vm897_vm4, %v692_v13, %v906_v42 }
  0xd4   : > { %v908_v23 = vsel %vm899_vm5, %v699_v63, %v907_v22 }
  0xd5   : > { %2055 = vmax.xlane.f32.xlu1 %v2054_v1  ;;  %v909_v28 = vsel %vm901_vm6, %v706_v27, %v908_v23 }
  0xd6   : > { %v910_v29 = vsel %vm903_vm7, %v713_v61, %v909_v28 }
  0xd7   : > { %v933_v32 = vsel %vm931_vm8, %v846_v50, %v910_v29 }
  0xd8   : > { %944 = vrot.lane.b32.xlu0 %v933_v32, %s2723_s22  ;;  %v2061_v34 = vsel %vm1945_vm10, %v933_v32, -inf }
  0xd9   : > { %2062 = vmax.xlane.f32.xlu1 %v2061_v34 }
  0xdd   : > { %2068 = vmax.xlane.f32.xlu1 %v2067_v35 }
  0xff   : > { %v943_v12 = vpop.permute.xlu0 %942 }
 0x100   : > { %v966_v24 = vsel %vm964_vm11, %v943_v12, -inf  ;;  %v947_v41 = vpop.permute.xlu1 %946 }
 0x101   : > { %v974_v36 = vmax.f32 %v3079_v37, %v966_v24  ;;  %v968_v39 = vsel %vm964_vm11, %v947_v41, -inf }
 0x102   : > { %v976_v40 = vmax.f32 %v3081_v44, %v968_v39 }
 0x103   : > { %v951_v33 = vpop.permute.xlu0 %950  ;;  %991 = vrot.lane.b32.xlu1 %v974_v36, %s2723_s22 }
 0x104   : > { %v955_v8 = vpop.permute.xlu1 %954  ;;  %v970_v43 = vsel %vm964_vm11, %v951_v33, -inf }
 0x105   : > { %v972_v9 = vsel %vm964_vm11, %v955_v8, -inf  ;;  %v978_v45 = vmax.f32 %v3085_v49, %v970_v43 }
 0x106   : > { %v980_v47 = vmax.f32 %v3092_v55, %v972_v9 }
 0x107   : > { %995 = vrot.lane.b32.xlu1 %v976_v40, %s2723_s22 }
 0x10b   : > { %999 = vrot.lane.b32.xlu1 %v978_v45, %s2723_s22 }
 0x10f   : > { %1003 = vrot.lane.b32.xlu1 %v980_v47, %s2723_s22 }
 0x110   : > { %v949_v16 = vpop.permute.xlu1 %948 }
 0x111   : > { %v969_v38 = vsel %vm964_vm11, %v949_v16, -inf }
 0x112   : > { %v3267_v3 = vmax.f32 %v3138_v18, %v969_v38 }
 0x123   : > { %v953_v19 = vpop.permute.xlu1 %952 }
 0x13d   : > { %v2060_v37 = vpop.xlane.xlu0 %2059 }
 0x13e   : > { %2082 = vst.msk [vmem:[%s3248_s29 + $0x8] sm:$0x1] %vm2081_vm12, %v2060_v37 }
 0x141   : > { %v2066_v44 = vpop.xlane.xlu0 %2065 }
 0x142   : > { %2084 = vst.msk [vmem:[%s3248_s29 + $0x18] sm:$0x1] %vm2081_vm12, %v2066_v44 }
 0x145   : > { %v2072_v49 = vpop.xlane.xlu0 %2071 }
 0x146   : > { %2086 = vst.msk [vmem:[%s3248_s29 + $0x28] sm:$0x1] %vm2081_vm12, %v2072_v49 }
 0x149   : > { %v941_v48 = vpop.permute.xlu0 %940 }
 0x14a   : > { %v965_v52 = vsel %vm964_vm11, %v941_v48, -inf }
 0x14b   : > { %v3258_v53 = vmax.f32 %v3214_v56, %v965_v52  ;;  %v971_v56 = vsel %vm964_vm11, %v953_v19, -inf }
 0x14c   : > { %v3273_v31 = vmax.f32 %v3176_v0, %v971_v56 }
 0x14d   : > { %989 = vrot.lane.b32.xlu0 %v3258_v53, %s2723_s22  ;;  %v945_v59 = vpop.permute.xlu0 %944 }
 0x14e   : > { %v967_v2 = vsel %vm964_vm11, %v945_v59, -inf }
 0x14f   : > { %v3264_v46 = vmax.f32 %v933_v32, %v967_v2 }
 0x151   : > { %993 = vrot.lane.b32.xlu0 %v3264_v46, %s2723_s22 }
 0x155   : > { %997 = vrot.lane.b32.xlu0 %v3267_v3, %s2723_s22 }
 0x159   : > { %1001 = vrot.lane.b32.xlu0 %v3273_v31, %s2723_s22 }
 0x162   : > { %v2056_v62 = vpop.xlane.xlu1 %2055 }
 0x163   : > { %2080 = vst.msk [vmem:[%s3248_s29] sm:$0xff] %vm2079_vm13, %v2056_v62 }
 0x166   : > { %v2063_v18 = vpop.xlane.xlu1 %2062 }
 0x167   : > { %2083 = vst.msk [vmem:[%s3248_s29 + $0x10] sm:$0xff] %vm2079_vm13, %v2063_v18 }
 0x16a   : > { %v2069_v17 = vpop.xlane.xlu1 %2068 }
 0x16b   : > { %2085 = vst.msk [vmem:[%s3248_s29 + $0x20] sm:$0xff] %vm2079_vm13, %v2069_v17 }
 0x175   : > { %v992_v25 = vpop.permute.xlu1 %991 }
 0x176   : > { %v1014_v4 = vsel %vm964_vm11, %v992_v25, -inf }
 0x177   : > { %v3286_v5 = vmax.f32 %v974_v36, %v1014_v4 }
 0x179   : > { %1135 = vrot.lane.b32.xlu0 %v3286_v5, %s2724_s15  ;;  %1039 = vrot.lane.b32.xlu1 %v3286_v5, %s2725_s4  ;;  %v996_v51 = vpop.permute.xlu1 %995 }
 0x17a   : > { %v1016_v57 = vsel %vm964_vm11, %v996_v51, -inf }
 0x17b   : > { %v3293_v6 = vmax.f32 %v976_v40, %v1016_v57 }
 0x17d   : > { %1043 = vrot.lane.b32.xlu1 %v3293_v6, %s2725_s4  ;;  %v1000_v60 = vpop.permute.xlu1 %999 }
 0x17e   : > { %v1018_v14 = vsel %vm964_vm11, %v1000_v60, -inf }
 0x17f   : > { %v3298_v11 = vmax.f32 %v978_v45, %v1018_v14  ;;  %v2731_v45 = vmov 1934713408  }
 0x181   : > { %1143 = vrot.lane.b32.xlu0 %v3298_v11, %s2724_s15  ;;  %1047 = vrot.lane.b32.xlu1 %v3298_v11, %s2725_s4  ;;  %v1004_v26 = vpop.permute.xlu1 %1003 }
 0x182   : > { %v1020_v10 = vsel %vm964_vm11, %v1004_v26, -inf }
 0x183   : > { %v3305_v54 = vmax.f32 %v980_v47, %v1020_v10  ;;  %v1272_v47 = vunpack.c.l.s4 %v2731_v45 }
 0x185   : > { %1159 = vrot.lane.b32.xlu0 %v3286_v5, %s2726_s25  ;;  %1051 = vrot.lane.b32.xlu1 %v3305_v54, %s2725_s4  ;;  %v1273_v16 = vunpack.c.0.s8 %v1272_v47 }
 0x189   : > { %1167 = vrot.lane.b32.xlu0 %v3298_v11, %s2726_s25  ;;  %1063 = vrot.lane.b32.xlu1 %v3286_v5, %s2727_s26 }
 0x18d   : > { %1183 = vrot.lane.b32.xlu0 %v3286_v5, %s2728_s18  ;;  %1067 = vrot.lane.b32.xlu1 %v3293_v6, %s2727_s26 }
 0x191   : > { %1191 = vrot.lane.b32.xlu0 %v3298_v11, %s2728_s18  ;;  %1071 = vrot.lane.b32.xlu1 %v3298_v11, %s2727_s26 }
 0x195   : > { %1075 = vrot.lane.b32.xlu1 %v3305_v54, %s2727_s26 }
 0x199   : > { %1087 = vrot.lane.b32.xlu1 %v3286_v5, %s2729_s6 }
 0x19d   : > { %1091 = vrot.lane.b32.xlu1 %v3293_v6, %s2729_s6 }
 0x1a1   : > { %1095 = vrot.lane.b32.xlu1 %v3298_v11, %s2729_s6 }
 0x1a5   : > { %1099 = vrot.lane.b32.xlu1 %v3305_v54, %s2729_s6 }
 0x1a9   : > { %1111 = vrot.lane.b32.xlu1 %v3286_v5, %s2730_s5 }
 0x1ad   : > { %1115 = vrot.lane.b32.xlu1 %v3293_v6, %s2730_s5 }
 0x1b1   : > { %1119 = vrot.lane.b32.xlu1 %v3298_v11, %s2730_s5 }
 0x1b5   : > { %1123 = vrot.lane.b32.xlu1 %v3305_v54, %s2730_s5 }
 0x1b9   : > { %1139 = vrot.lane.b32.xlu1 %v3293_v6, %s2724_s15 }
 0x1bd   : > { %1147 = vrot.lane.b32.xlu1 %v3305_v54, %s2724_s15 }
 0x1bf   : > { %v990_v20 = vpop.permute.xlu0 %989 }
 0x1c0   : > { %v1013_v15 = vsel %vm964_vm11, %v990_v20, -inf }
 0x1c1   : > { %v3347_v63 = vmax.f32 %v3258_v53, %v1013_v15  ;;  %1163 = vrot.lane.b32.xlu1 %v3293_v6, %s2726_s25 }
 0x1c3   : > { %v994_v1 = vpop.permute.xlu0 %993  ;;  %1037 = vrot.lane.b32.xlu0 %v3347_v63, %s2725_s4 }
 0x1c4   : > { %v1015_v13 = vsel %vm964_vm11, %v994_v1, -inf }
 0x1c5   : > { %v3355_v27 = vmax.f32 %v3264_v46, %v1015_v13  ;;  %1171 = vrot.lane.b32.xlu1 %v3305_v54, %s2726_s25  ;;  %v3437_v46 = vsub.s32 %v1273_v16, %v2979_v30 }
 0x1c7   : > { %v998_v21 = vpop.permute.xlu0 %997  ;;  %1041 = vrot.lane.b32.xlu0 %v3355_v27, %s2725_s4 }
 0x1c8   : > { %v1017_v61 = vsel %vm964_vm11, %v998_v21, -inf }
 0x1c9   : > { %v3363_v42 = vmax.f32 %v3267_v3, %v1017_v61  ;;  %1187 = vrot.lane.b32.xlu1 %v3293_v6, %s2728_s18 }
 0x1cb   : > { %v1002_v50 = vpop.permute.xlu0 %1001  ;;  %1045 = vrot.lane.b32.xlu0 %v3363_v42, %s2725_s4 }
 0x1cc   : > { %v1019_v22 = vsel %vm964_vm11, %v1002_v50, -inf }
 0x1cd   : > { %v3371_v23 = vmax.f32 %v3273_v31, %v1019_v22  ;;  %1195 = vrot.lane.b32.xlu1 %v3305_v54, %s2728_s18 }
 0x1cf   : > { %1049 = vrot.lane.b32.xlu0 %v3371_v23, %s2725_s4 }
 0x1d1   : > { %1137 = vrot.lane.b32.xlu1 %v3355_v27, %s2724_s15 }
 0x1d3   : > { %1061 = vrot.lane.b32.xlu0 %v3347_v63, %s2727_s26 }
 0x1d5   : > { %1145 = vrot.lane.b32.xlu1 %v3371_v23, %s2724_s15 }
 0x1d7   : > { %1065 = vrot.lane.b32.xlu0 %v3355_v27, %s2727_s26 }
 0x1d9   : > { %1161 = vrot.lane.b32.xlu1 %v3355_v27, %s2726_s25 }
 0x1db   : > { %1069 = vrot.lane.b32.xlu0 %v3363_v42, %s2727_s26 }
 0x1dd   : > { %1169 = vrot.lane.b32.xlu1 %v3371_v23, %s2726_s25 }
 0x1df   : > { %1073 = vrot.lane.b32.xlu0 %v3371_v23, %s2727_s26 }
 0x1e1   : > { %1185 = vrot.lane.b32.xlu1 %v3355_v27, %s2728_s18 }
 0x1e3   : > { %1085 = vrot.lane.b32.xlu0 %v3347_v63, %s2729_s6 }
 0x1e5   : > { %1193 = vrot.lane.b32.xlu1 %v3371_v23, %s2728_s18 }
 0x1e7   : > { %1089 = vrot.lane.b32.xlu0 %v3355_v27, %s2729_s6 }
 0x1eb   : > { %1093 = vrot.lane.b32.xlu0 %v3363_v42, %s2729_s6  ;;  %v1040_v28 = vpop.permute.xlu1 %1039  ;;  %v1136_v24 = vpop.permute.xlu0 %1135 }
 0x1ef   : > { %1097 = vrot.lane.b32.xlu0 %v3371_v23, %s2729_s6  ;;  %v3405_v29 = vpop.permute.xlu1 %1043 }
 0x1f3   : > { %1109 = vrot.lane.b32.xlu0 %v3347_v63, %s2730_s5  ;;  %v1048_v32 = vpop.permute.xlu1 %1047  ;;  %v1144_v36 = vpop.permute.xlu0 %1143 }
 0x1f7   : > { %1113 = vrot.lane.b32.xlu0 %v3355_v27, %s2730_s5  ;;  %v3411_v34 = vpop.permute.xlu1 %1051  ;;  %v1160_v40 = vpop.permute.xlu0 %1159 }
 0x1fb   : > { %1117 = vrot.lane.b32.xlu0 %v3363_v42, %s2730_s5  ;;  %v1064_v35 = vpop.permute.xlu1 %1063  ;;  %v1168_v43 = vpop.permute.xlu0 %1167 }
 0x1fc   : > { %v1341_v48 = vcombine.low %v3286_v5, %v1064_v35 }
 0x1fe   : > { %v1348_v2 = vrot.slane %v1341_v48, %v3012_v58 }
 0x1ff   : > { %1121 = vrot.lane.b32.xlu0 %v3371_v23, %s2730_s5  ;;  %v3417_v12 = vpop.permute.xlu1 %1067  ;;  %v1184_v44 = vpop.permute.xlu0 %1183 }
 0x200   : > { %v1365_v52 = vcombine.low %v1136_v24, %v1184_v44 }
 0x202   : > { %v1372_v19 = vrot.slane %v1365_v52, %v3012_v58 }
 0x203   : > { %1133 = vrot.lane.b32.xlu0 %v3347_v63, %s2724_s15  ;;  %v1072_v41 = vpop.permute.xlu1 %1071  ;;  %v1192_v62 = vpop.permute.xlu0 %1191 }
 0x204   : > { %v1711_v17 = vcombine.low %v3298_v11, %v1072_v41  ;;  %v1735_v4 = vcombine.low %v1144_v36, %v1192_v62 }
 0x206   : > { %v1718_v14 = vrot.slane %v1711_v17, %v3012_v58  ;;  %v1742_v20 = vrot.slane %v1735_v4, %v3012_v58 }
 0x207   : > { %1141 = vrot.lane.b32.xlu0 %v3363_v42, %s2724_s15  ;;  %v3423_v39 = vpop.permute.xlu1 %1075 }
 0x208   : > { %v1896_v48 = vcombine.low %v3305_v54, %v3423_v39 }
 0x20b   : > { %1157 = vrot.lane.b32.xlu0 %v3347_v63, %s2726_s25  ;;  %v1088_v33 = vpop.permute.xlu1 %1087 }
 0x20c   : > { %v1349_v37 = vcombine.low %v1040_v28, %v1088_v33 }
 0x20e   : > { %v1356_v53 = vrot.slane %v1349_v37, %v3012_v58 }
 0x20f   : > { %1165 = vrot.lane.b32.xlu0 %v3363_v42, %s2726_s25  ;;  %v1092_v8 = vpop.permute.xlu1 %1091 }
 0x210   : > { %v1373_v3 = vcombine.low %v1348_v2, %v1356_v53  ;;  %v1534_v41 = vcombine.low %v3405_v29, %v1092_v8 }
 0x212   : > { %v1380_v51 = vrot.slane %v1373_v3, %v3437_v46 }
 0x213   : > { %1181 = vrot.lane.b32.xlu0 %v3347_v63, %s2728_s18  ;;  %v1096_v9 = vpop.permute.xlu1 %1095 }
 0x214   : > { %v1719_v56 = vcombine.low %v1048_v32, %v1096_v9 }
 0x216   : > { %v1726_v5 = vrot.slane %v1719_v56, %v3012_v58 }
 0x217   : > { %1189 = vrot.lane.b32.xlu0 %v3363_v42, %s2728_s18  ;;  %v1100_v49 = vpop.permute.xlu1 %1099 }
 0x218   : > { %v1743_v15 = vcombine.low %v1718_v14, %v1726_v5  ;;  %v1904_v45 = vcombine.low %v3411_v34, %v1100_v49  ;;  %v1903_v34 = vrot.slane %v1896_v48, %v3012_v58 }
 0x21a   : > { %v1750_v61 = vrot.slane %v1743_v15, %v3437_v46 }
 0x21b   : > { %v1112_v59 = vpop.permute.xlu1 %1111 }
 0x21c   : > { %v1357_v38 = vcombine.low %v1112_v59, %v1160_v40  ;;  %v1526_v40 = vcombine.low %v3293_v6, %v3417_v12  ;;  %v1911_v6 = vrot.slane %v1904_v45, %v3012_v58 }
 0x21e   : > { %v1364_v31 = vrot.slane %v1357_v38, %v3012_v58  ;;  %v1533_v37 = vrot.slane %v1526_v40, %v3012_v58  ;;  %v1928_v39 = vcombine.low %v1903_v34, %v1911_v6 }
 0x21f   : > { %v1116_v18 = vpop.permute.xlu1 %1115 }
 0x220   : > { %v1381_v25 = vcombine.low %v1364_v31, %v1372_v19 }
 0x222   : > { %v1388_v57 = vrot.slane %v1381_v25, %v3437_v46  ;;  %v1935_v25 = vrot.slane %v1928_v39, %v3437_v46 }
 0x223   : > { %v1120_v60 = vpop.permute.xlu1 %1119 }
 0x224   : > { %v1727_v26 = vcombine.low %v1120_v60, %v1168_v43  ;;  %v1389_v10 = vcombine.low %v1380_v51, %v1388_v57  ;;  %v1541_v43 = vrot.slane %v1534_v41, %v3012_v58 }
 0x226   : > { %v1734_v1 = vrot.slane %v1727_v26, %v3012_v58  ;;  %v1970_v11 = vsel %vm1945_vm10, %v1389_v10, -inf  ;;  %v1558_v29 = vcombine.low %v1533_v37, %v1541_v43 }
 0x227   : > { %1971 = vmax.xlane.f32.xlu1 %v1970_v11  ;;  %v1124_v13 = vpop.permute.xlu1 %1123 }
 0x228   : > { %v1751_v21 = vcombine.low %v1734_v1, %v1742_v20  ;;  %v1565_v54 = vrot.slane %v1558_v29, %v3437_v46 }
 0x22a   : > { %v1758_v50 = vrot.slane %v1751_v21, %v3437_v46 }
 0x22b   : > { %v1140_v22 = vpop.permute.xlu1 %1139 }
 0x22c   : > { %v1759_v28 = vcombine.low %v1750_v61, %v1758_v50 }
 0x22e   : > { %v2024_v32 = vsel %vm1945_vm10, %v1759_v28, -inf }
 0x22f   : > { %2025 = vmax.xlane.f32.xlu1 %v2024_v32  ;;  %v1148_v35 = vpop.permute.xlu1 %1147 }
 0x233   : > { %v1164_v24 = vpop.permute.xlu1 %1163 }
 0x234   : > { %v1542_v47 = vcombine.low %v1116_v18, %v1164_v24 }
 0x235   : > { %v1038_v36 = vpop.permute.xlu0 %1037 }
 0x236   : > { %v1549_v12 = vrot.slane %v1542_v47, %v3012_v58 }
 0x237   : > { %v1172_v33 = vpop.permute.xlu1 %1171 }
 0x238   : > { %v1912_v52 = vcombine.low %v1124_v13, %v1172_v33 }
 0x239   : > { %v3456_v9 = vpop.permute.xlu0 %1041 }
 0x23a   : > { %v1919_v19 = vrot.slane %v1912_v52, %v3012_v58 }
 0x23b   : > { %v1188_v44 = vpop.permute.xlu1 %1187 }
 0x23c   : > { %v1550_v16 = vcombine.low %v1140_v22, %v1188_v44 }
 0x23d   : > { %v3462_v8 = vpop.permute.xlu0 %1045 }
 0x23e   : > { %v1557_v53 = vrot.slane %v1550_v16, %v3012_v58 }
 0x23f   : > { %v1196_v59 = vpop.permute.xlu1 %1195 }
 0x240   : > { %v1566_v49 = vcombine.low %v1549_v12, %v1557_v53  ;;  %v1920_v2 = vcombine.low %v1148_v35, %v1196_v59 }
 0x241   : > { %v3468_v38 = vpop.permute.xlu0 %1049 }
 0x242   : > { %v1927_v3 = vrot.slane %v1920_v2, %v3012_v58  ;;  %v1573_v56 = vrot.slane %v1566_v49, %v3437_v46 }
 0x243   : > { %v3478_v60 = vpop.permute.xlu1 %1137 }
 0x244   : > { %v1936_v31 = vcombine.low %v1919_v19, %v1927_v3  ;;  %v1574_v62 = vcombine.low %v1565_v54, %v1573_v56 }
 0x245   : > { %v1062_v18 = vpop.permute.xlu0 %1061 }
 0x246   : > { %v1997_v17 = vsel %vm1945_vm10, %v1574_v62, -inf  ;;  %v1943_v4 = vrot.slane %v1936_v31, %v3437_v46  ;;  %v1205_v20 = vcombine.low %v3347_v63, %v1062_v18  ;;  %v1206_v15 = vcombine.high %v3347_v63, %v1062_v18 }
 0x247   : > { %1998 = vmax.xlane.f32.xlu0 %v1997_v17  ;;  %v3480_v10 = vpop.permute.xlu1 %1145 }
 0x248   : > { %v1944_v5 = vcombine.low %v1935_v25, %v1943_v4  ;;  %v3485_v21 = vrot.slane %v1205_v20, %v3012_v58  ;;  %v3488_v61 = vrot.slane %v1206_v15, %v3012_v58 }
 0x249   : > { %v1066_v51 = vpop.permute.xlu0 %1065 }
 0x24a   : > { %v2051_v57 = vsel %vm1945_vm10, %v1944_v5, -inf  ;;  %v1390_v28 = vcombine.low %v3355_v27, %v1066_v51  ;;  %v1391_v32 = vcombine.high %v3355_v27, %v1066_v51 }
 0x24b   : > { %2052 = vmax.xlane.f32.xlu0 %v2051_v57  ;;  %v3498_v63 = vpop.permute.xlu1 %1161 }
 0x24c   : > { %v3513_v47 = vrot.slane %v1390_v28, %v3012_v58  ;;  %v1405_v37 = vrot.slane %v1391_v32, %v3012_v58 }
 0x24d   : > { %v1070_v14 = vpop.permute.xlu0 %1069 }
 0x24e   : > { %v1575_v27 = vcombine.low %v3363_v42, %v1070_v14  ;;  %v1576_v45 = vcombine.high %v3363_v42, %v1070_v14 }
 0x250   : > { %v3529_v59 = vrot.slane %v1575_v27, %v3012_v58  ;;  %v3532_v34 = vrot.slane %v1576_v45, %v3012_v58 }
 0x251   : > { %v1074_v26 = vpop.permute.xlu0 %1073 }
 0x252   : > { %v1760_v2 = vcombine.low %v3371_v23, %v1074_v26  ;;  %v1761_v54 = vcombine.high %v3371_v23, %v1074_v26 }
 0x254   : > { %v3553_v17 = vrot.slane %v1760_v2, %v3012_v58  ;;  %v3556_v23 = vrot.slane %v1761_v54, %v3012_v58 }
 0x255   : > { %v1086_v1 = vpop.permute.xlu0 %1085 }
 0x256   : > { %v1221_v11 = vcombine.low %v1038_v36, %v1086_v1  ;;  %v1222_v13 = vcombine.high %v1038_v36, %v1086_v1 }
 0x258   : > { %v3491_v50 = vrot.slane %v1221_v11, %v3012_v58  ;;  %v3494_v22 = vrot.slane %v1222_v13, %v3012_v58 }
 0x259   : > { %v1090_v35 = vpop.permute.xlu0 %1089 }
 0x25a   : > { %v1269_v24 = vcombine.low %v3485_v21, %v3491_v50  ;;  %v1270_v41 = vcombine.high %v3485_v21, %v3491_v50  ;;  %v1285_v36 = vcombine.low %v3488_v61, %v3494_v22  ;;  %v1406_v33 = vcombine.low %v3456_v9, %v1090_v35 }
 0x25b   : > { %v1407_v43 = vcombine.high %v3456_v9, %v1090_v35  ;;  %v3522_v9 = vpop.permute.xlu1 %1169 }
 0x25c   : > { %v3517_v44 = vrot.slane %v1406_v33, %v3012_v58  ;;  %v1284_v56 = vrot.slane %v1270_v41, %v3437_v46 }
 0x25d   : > { %v1421_v48 = vrot.slane %v1407_v43, %v3012_v58  ;;  %v1094_v16 = vpop.permute.xlu0 %1093 }
 0x25e   : > { %v1591_v29 = vcombine.low %v3462_v8, %v1094_v16  ;;  %v1592_v6 = vcombine.high %v3462_v8, %v1094_v16  ;;  %v1454_v42 = vcombine.low %v3513_v47, %v3517_v44  ;;  %v1455_v12 = vcombine.high %v3513_v47, %v3517_v44 }
 0x25f   : > { %v1470_v52 = vcombine.low %v1405_v37, %v1421_v48  ;;  %v1471_v53 = vcombine.high %v1405_v37, %v1421_v48  ;;  %v1186_v25 = vpop.permute.xlu1 %1185 }
 0x260   : > { %v3535_v49 = vrot.slane %v1591_v29, %v3012_v58  ;;  %v3538_v8 = vrot.slane %v1592_v6, %v3012_v58  ;;  %v1439_v20 = vcombine.high %v3478_v60, %v1186_v25 }
 0x261   : > { %v1098_v39 = vpop.permute.xlu0 %1097  ;;  %v3586_v27 = vrot.slane %v1470_v52, %v3437_v46  ;;  %v3598_v29 = vrot.slane %v1471_v53, %v3437_v46 }
 0x262   : > { %v1639_v19 = vcombine.low %v3529_v59, %v3535_v49  ;;  %v1640_v3 = vcombine.high %v3529_v59, %v3535_v49  ;;  %v1776_v62 = vcombine.low %v3468_v38, %v1098_v39  ;;  %v1777_v18 = vcombine.high %v3468_v38, %v1098_v39 }
 0x263   : > { %v1453_v11 = vrot.slane %v1439_v20, %v3012_v58 }
 0x264   : > { %v3559_v4 = vrot.slane %v1776_v62, %v3012_v58  ;;  %v3562_v5 = vrot.slane %v1777_v18, %v3012_v58  ;;  %v1438_v18 = vcombine.low %v3478_v60, %v1186_v25  ;;  %v1647_v21 = vrot.slane %v1639_v19, %v3437_v46 }
 0x265   : > { %v3564_v51 = vpop.permute.xlu0 %1109 }
 0x266   : > { %v1824_v57 = vcombine.low %v3553_v17, %v3559_v4  ;;  %v1825_v38 = vcombine.high %v3553_v17, %v3559_v4  ;;  %v1654_v4 = vrot.slane %v1640_v3, %v3437_v46 }
 0x268   : > { %v1839_v47 = vrot.slane %v1825_v38, %v3437_v46 }
 0x269   : > { %v1114_v15 = vpop.permute.xlu0 %1113 }
 0x26a   : > { %v1423_v1 = vcombine.high %v1114_v15, %v3498_v63  ;;  %v1422_v39 = vcombine.low %v1114_v15, %v3498_v63 }
 0x26c   : > { %v1437_v13 = vrot.slane %v1423_v1, %v3012_v58  ;;  %v1430_v20 = vrot.slane %v1422_v39, %v3012_v58 }
 0x26d   : > { %v3578_v28 = vpop.permute.xlu0 %1117 }
 0x26e   : > { %v1502_v32 = vcombine.low %v1437_v13, %v1453_v11  ;;  %v1503_v35 = vcombine.high %v1437_v13, %v1453_v11  ;;  %v1446_v11 = vrot.slane %v1438_v18, %v3012_v58  ;;  %v3616_v13 = vpop.permute.xlu1 %1193 }
 0x26f   : > { %v1808_v25 = vcombine.low %v3480_v10, %v3616_v13 }
 0x270   : > { %v3581_v33 = vrot.slane %v1502_v32, %v3437_v46  ;;  %v3593_v48 = vrot.slane %v1503_v35, %v3437_v46  ;;  %v1486_v63 = vcombine.low %v1430_v20, %v1446_v11  ;;  %v1487_v50 = vcombine.high %v1430_v20, %v1446_v11 }
 0x271   : > { %v3583_v43 = vpop.permute.xlu0 %1121  ;;  %v1816_v45 = vrot.slane %v1808_v25, %v3012_v58 }
 0x272   : > { %v1792_v35 = vcombine.low %v3583_v43, %v3522_v9  ;;  %v1494_v40 = vrot.slane %v1486_v63, %v3437_v46  ;;  %v1501_v19 = vrot.slane %v1487_v50, %v3437_v46  ;;  %v1793_v38 = vcombine.high %v3583_v43, %v3522_v9 }
 0x273   : > { %v1293_v9 = vrot.slane %v1285_v36, %v3437_v46  ;;  %v3933_v36 = vcombine.low %v3532_v34, %v3538_v8 }
 0x274   : > { %v1800_v26 = vrot.slane %v1792_v35, %v3012_v58  ;;  %v1807_v59 = vrot.slane %v1793_v38, %v3012_v58 }
 0x275   : > { %v3595_v16 = vpop.permute.xlu0 %1133 }
 0x279   : > { %v3604_v2 = vpop.permute.xlu0 %1141 }
 0x27d   : > { %v3606_v54 = vpop.permute.xlu0 %1157 }
 0x27e   : > { %v1237_v53 = vcombine.low %v3564_v51, %v3606_v54 }
 0x280   : > { %v1245_v15 = vrot.slane %v1237_v53, %v3012_v58  ;;  %v1277_v53 = vrot.slane %v1269_v24, %v3437_v46  ;;  %v1462_v24 = vrot.slane %v1454_v42, %v3437_v46 }
 0x281   : > { %v3609_v62 = vpop.permute.xlu0 %1165 }
 0x282   : > { %v1607_v39 = vcombine.low %v3578_v28, %v3609_v62  ;;  %v1608_v44 = vcombine.high %v3578_v28, %v3609_v62 }
 0x284   : > { %v1622_v17 = vrot.slane %v1608_v44, %v3012_v58 }
 0x285   : > { %v1182_v1 = vpop.permute.xlu0 %1181 }
 0x286   : > { %v1253_v32 = vcombine.low %v3595_v16, %v1182_v1  ;;  %v1254_v20 = vcombine.high %v3595_v16, %v1182_v1 }
 0x288   : > { %v1261_v60 = vrot.slane %v1253_v32, %v3012_v58  ;;  %v3678_v16 = vrot.slane %v1254_v20, %v3012_v58 }
 0x289   : > { %v3627_v52 = vpop.permute.xlu0 %1189 }
 0x28a   : > { %v1301_v18 = vcombine.low %v1245_v15, %v1261_v60  ;;  %v1302_v6 = vcombine.high %v1245_v15, %v1261_v60  ;;  %v1623_v37 = vcombine.low %v3604_v2, %v3627_v52  ;;  %v1615_v15 = vrot.slane %v1607_v39, %v3012_v58 }
 0x28b   : > { %v1624_v1 = vcombine.high %v3604_v2, %v3627_v52 }
 0x28c   : > { %v1309_v32 = vrot.slane %v1301_v18, %v3437_v46  ;;  %v1316_v31 = vrot.slane %v1302_v6, %v3437_v46  ;;  %v1631_v35 = vrot.slane %v1623_v37, %v3012_v58  ;;  %v1856_v6 = vcombine.low %v1800_v26, %v1816_v45 }
 0x28d   : > { %v1518_v37 = vcombine.low %v1462_v24, %v1494_v40  ;;  %v3692_v2 = vrot.slane %v1624_v1, %v3012_v58 }
 0x28e   : > { %v1334_v60 = vcombine.high %v1277_v53, %v1309_v32  ;;  %v1333_v14 = vcombine.low %v1277_v53, %v1309_v32  ;;  %v1671_v63 = vcombine.low %v1615_v15, %v1631_v35  ;;  %v1335_v18 = vcombine.low %v1284_v56, %v1316_v31 }
 0x28f   : > { %v1864_v41 = vrot.slane %v1856_v6, %v3437_v46  ;;  %v1973_v32 = vsel %vm1945_vm10, %v1518_v37, -inf  ;;  %v1687_v37 = vcombine.low %v1622_v17, %v3692_v2 }
 0x290   : > { %v1949_v25 = vsel %vm1945_vm10, %v1334_v60, -inf  ;;  %v1946_v39 = vsel %vm1945_vm10, %v1333_v14, -inf  ;;  %v1679_v53 = vrot.slane %v1671_v63, %v3437_v46  ;;  %v1952_v42 = vsel %vm1945_vm10, %v1335_v18, -inf }
 0x291   : > { %1950 = vmax.xlane.f32.xlu1 %v1949_v25  ;;  %1947 = vmax.xlane.f32.xlu0 %v1946_v39  ;;  %v1336_v60 = vcombine.high %v1284_v56, %v1316_v31  ;;  %v1832_v63 = vrot.slane %v1824_v57, %v3437_v46  ;;  %v1857_v25 = vcombine.high %v1800_v26, %v1816_v45 }
 0x292   : > { %v1703_v14 = vcombine.low %v1647_v21, %v1679_v53  ;;  %v1519_v39 = vcombine.high %v1462_v24, %v1494_v40  ;;  %v1469_v56 = vrot.slane %v1455_v12, %v3437_v46  ;;  %v1238_v31 = vcombine.high %v3564_v51, %v3606_v54 }
 0x293   : > { %v1888_v7 = vcombine.low %v1832_v63, %v1864_v41  ;;  %v1955_v11 = vsel %vm1945_vm10, %v1336_v60, -inf  ;;  %v1871_v45 = vrot.slane %v1857_v25, %v3437_v46  ;;  %v1672_v24 = vcombine.high %v1615_v15, %v1631_v35 }
 0x294   : > { %v2000_v6 = vsel %vm1945_vm10, %v1703_v14, -inf  ;;  %v1976_v40 = vsel %vm1945_vm10, %v1519_v39, -inf  ;;  %v1520_v26 = vcombine.low %v1469_v56, %v1501_v19  ;;  %v1704_v18 = vcombine.high %v1647_v21, %v1679_v53 }
 0x295   : > { %1953 = vmax.xlane.f32.xlu0 %v1952_v42  ;;  %1974 = vmax.xlane.f32.xlu1 %v1973_v32  ;;  %v2027_v57 = vsel %vm1945_vm10, %v1888_v7, -inf  ;;  %v1252_v7 = vrot.slane %v1238_v31, %v3012_v58  ;;  %v1889_v51 = vcombine.high %v1832_v63, %v1864_v41  ;;  %v1890_v54 = vcombine.low %v1839_v47, %v1871_v45 }
 0x296   : > { %v1979_v12 = vsel %vm1945_vm10, %v1520_v26, -inf  ;;  %v2003_v15 = vsel %vm1945_vm10, %v1704_v18, -inf  ;;  %v1686_v35 = vrot.slane %v1672_v24, %v3437_v46  ;;  %v1809_v41 = vcombine.high %v3480_v10, %v3616_v13 }
 0x297   : > { %v1317_v52 = vcombine.low %v1252_v7, %v3678_v16  ;;  %v2030_v28 = vsel %vm1945_vm10, %v1889_v51, -inf  ;;  %v2033_v62 = vsel %vm1945_vm10, %v1890_v54, -inf  ;;  %v1521_v49 = vcombine.high %v1469_v56, %v1501_v19 }
 0x298   : > { %v1705_v53 = vcombine.low %v1654_v4, %v1686_v35  ;;  %v1706_v21 = vcombine.high %v1654_v4, %v1686_v35  ;;  %v1695_v32 = vrot.slane %v1687_v37, %v3437_v46  ;;  %v1823_v60 = vrot.slane %v1809_v41, %v3012_v58 }
 0x299   : > { %1956 = vmax.xlane.f32.xlu0 %v1955_v11  ;;  %2001 = vmax.xlane.f32.xlu1 %v2000_v6  ;;  %v1325_v50 = vrot.slane %v1317_v52, %v3437_v46  ;;  %v3932_v10 = vlaneseq  ;;  %v1663_v14 = vrot.slane %v3933_v36, %v3437_v46  ;;  %v1982_v25 = vsel %vm1945_vm10, %v1521_v49, -inf }
 0x29a   : > { %v2006_v3 = vsel %vm1945_vm10, %v1705_v53, -inf  ;;  %v2009_v43 = vsel %vm1945_vm10, %v1706_v21, -inf  ;;  %v1872_v63 = vcombine.low %v1807_v59, %v1823_v60  ;;  %v1891_v19 = vcombine.high %v1839_v47, %v1871_v45 }
 0x29b   : > { %v1337_v42 = vcombine.low %v1293_v9, %v1325_v50  ;;  %v2126_v13 = vand.u32 127, %v3932_v10  ;;  %v1707_v20 = vcombine.low %v1663_v14, %v1695_v32  ;;  %v1318_v6 = vcombine.high %v1252_v7, %v3678_v16 }
 0x29c   : > { %v1880_v58 = vrot.slane %v1872_v63, %v3437_v46  ;;  %v2036_v56 = vsel %vm1945_vm10, %v1891_v19, -inf  ;;  %v3934_v26 = vcombine.low %v3556_v23, %v3562_v5  ;;  %v3935_v16 = vcombine.low %v3586_v27, %v3581_v33 }
 0x29d   : > { %1977 = vmax.xlane.f32.xlu0 %v1976_v40  ;;  %2028 = vmax.xlane.f32.xlu1 %v2027_v57  ;;  %v1958_v39 = vsel %vm1945_vm10, %v1337_v42, -inf  ;;  %v2127_v11 = vadd.s32 4294967295, %v2126_v13  ;;  %v2012_v31 = vsel %vm1945_vm10, %v1707_v20, -inf  ;;  %v1338_v40 = vcombine.high %v1293_v9, %v1325_v50 }
 0x29e   : > { %v1848_v45 = vrot.slane %v3934_v26, %v3437_v46  ;;  %v1985_v1 = vsel %vm1945_vm10, %v3935_v16, -inf  ;;  %v1688_v18 = vcombine.high %v1622_v17, %v3692_v2  ;;  %v1708_v44 = vcombine.high %v1663_v14, %v1695_v32 }
 0x29f   : > { %v3730_v57 = vsub.s32 %v2127_v11, %v2979_v30  ;;  %v1961_v7 = vsel %vm1945_vm10, %v1338_v40, -inf  ;;  %v1332_v30 = vrot.slane %v1318_v6, %v3437_v46  ;;  %v3936_v51 = vcombine.high %v3488_v61, %v3494_v22 }
 0x2a0   : > { %v1892_v24 = vcombine.low %v1848_v45, %v1880_v58  ;;  %v2015_v2 = vsel %vm1945_vm10, %v1708_v44, -inf  ;;  %v1702_v35 = vrot.slane %v1688_v18, %v3437_v46  ;;  %v3937_v17 = vcombine.high %v3532_v34, %v3538_v8 }
 0x2a1   : > { %2004 = vmax.xlane.f32.xlu0 %v2003_v15  ;;  %1980 = vmax.xlane.f32.xlu1 %v1979_v12  ;;  %v1300_v54 = vrot.slane %v3936_v51, %v3437_v46  ;;  %v3938_v61 = vcombine.high %v3586_v27, %v3581_v33  ;;  %v1873_v38 = vcombine.high %v1807_v59, %v1823_v60  ;;  %v2076_v13 = vsel %vm2057_vm9, %v3092_v55, -inf }
 0x2a2   : > { %v2039_v52 = vsel %vm1945_vm10, %v1892_v24, -inf  ;;  %v1670_v4 = vrot.slane %v3937_v17, %v3437_v46  ;;  %v1893_v37 = vcombine.high %v1848_v45, %v1880_v58  ;;  %v3939_v27 = vcombine.high %v3556_v23, %v3562_v5 }
 0x2a3   : > { %v1339_v15 = vcombine.low %v1300_v54, %v1332_v30  ;;  %v1988_v22 = vsel %vm1945_vm10, %v3938_v61, -inf  ;;  %v1340_v50 = vcombine.high %v1300_v54, %v1332_v30  ;;  %v1887_v33 = vrot.slane %v1873_v38, %v3437_v46 }
 0x2a4   : > { %v1709_v53 = vcombine.low %v1670_v4, %v1702_v35  ;;  %v2042_v34 = vsel %vm1945_vm10, %v1893_v37, -inf  ;;  %v1855_v41 = vrot.slane %v3939_v27, %v3437_v46  ;;  %v3940_v9 = vcombine.low %v3598_v29, %v3593_v48 }
 0x2a5   : > { %2031 = vmax.xlane.f32.xlu0 %v2030_v28  ;;  %2034 = vmax.xlane.f32.xlu1 %v2033_v62  ;;  %v1964_v62 = vsel %vm1945_vm10, %v1339_v15, -inf  ;;  %v1967_v49 = vsel %vm1945_vm10, %v1340_v50, -inf  ;;  %v2073_v46 = vsel %vm1945_vm10, %v3176_v0, -inf  ;;  %v3941_v23 = vcombine.high %v3598_v29, %v3593_v48 }
 0x2a6   : > { %v2018_v8 = vsel %vm1945_vm10, %v1709_v53, -inf  ;;  %v1991_v59 = vsel %vm1945_vm10, %v3940_v9, -inf  ;;  %v1895_v60 = vcombine.high %v1855_v41, %v1887_v33 }
 0x2a7   : > { %v1994_v5 = vsel %vm1945_vm10, %v3941_v23, -inf }
 0x2a8   : > { %v2048_v10 = vsel %vm1945_vm10, %v1895_v60, -inf }
 0x2a9   : > { %2007 = vmax.xlane.f32.xlu0 %v2006_v3  ;;  %2010 = vmax.xlane.f32.xlu1 %v2009_v43  ;;  %v1894_v3 = vcombine.low %v1855_v41, %v1887_v33  ;;  %v1710_v43 = vcombine.high %v1670_v4, %v1702_v35 }
 0x2ab   : > { %v2045_v42 = vsel %vm1945_vm10, %v1894_v3, -inf  ;;  %v2021_v32 = vsel %vm1945_vm10, %v1710_v43, -inf }
 0x2ad   : > { %1983 = vmax.xlane.f32.xlu0 %v1982_v25  ;;  %1959 = vmax.xlane.f32.xlu1 %v1958_v39 }
 0x2b1   : > { %2037 = vmax.xlane.f32.xlu0 %v2036_v56  ;;  %2013 = vmax.xlane.f32.xlu1 %v2012_v31 }
 0x2b4   : > { %v1972_v47 = vpop.xlane.xlu1 %1971 }
 0x2b5   : > { %v2163_v12 = vrot.slane %v1972_v47, %v3730_v57  ;;  %1986 = vmax.xlane.f32.xlu0 %v1985_v1  ;;  %1962 = vmax.xlane.f32.xlu1 %v1961_v7 }
 0x2b7   : > { %2312 = vst.msk [vmem:[%s3248_s29 + $0x8] sm:$0x1] %vm2311_vm14, %v2163_v12 }
 0x2b9   : > { %2040 = vmax.xlane.f32.xlu0 %v2039_v52  ;;  %2016 = vmax.xlane.f32.xlu1 %v2015_v2 }
 0x2bc   : > { %v2026_v28 = vpop.xlane.xlu1 %2025 }
 0x2bd   : > { %v2235_v21 = vrot.slane %v2026_v28, %v3730_v57  ;;  %1989 = vmax.xlane.f32.xlu0 %v1988_v22  ;;  %1965 = vmax.xlane.f32.xlu1 %v1964_v62 }
 0x2bf   : > { %2316 = vst.msk [vmem:[%s3248_s29 + $0x28] sm:$0x1] %vm2311_vm14, %v2235_v21 }
 0x2c1   : > { %2043 = vmax.xlane.f32.xlu0 %v2042_v34  ;;  %2019 = vmax.xlane.f32.xlu1 %v2018_v8 }
 0x2c5   : > { %1992 = vmax.xlane.f32.xlu0 %v1991_v59  ;;  %1968 = vmax.xlane.f32.xlu1 %v1967_v49 }
 0x2c9   : > { %2046 = vmax.xlane.f32.xlu0 %v2045_v42  ;;  %2022 = vmax.xlane.f32.xlu1 %v2021_v32 }
 0x2cd   : > { %1995 = vmax.xlane.f32.xlu0 %v1994_v5  ;;  %2074 = vmax.xlane.f32.xlu1 %v2073_v46 }
 0x2d1   : > { %2049 = vmax.xlane.f32.xlu0 %v2048_v10 }
 0x2d4   : > { %v1999_v36 = vpop.xlane.xlu0 %1998 }
 0x2d5   : > { %v2199_v14 = vrot.slane %v1999_v36, %v3730_v57  ;;  %2077 = vmax.xlane.f32.xlu0 %v2076_v13 }
 0x2d7   : > { %2314 = vst.msk [vmem:[%s3248_s29 + $0x18] sm:$0x1] %vm2311_vm14, %v2199_v14 }
 0x2d8   : > { %v3791_v0 = vpop.xlane.xlu0 %2052 }
 0x31e   : > { %v1948_v48 = vpop.xlane.xlu0 %1947  ;;  %v1951_v29 = vpop.xlane.xlu1 %1950 }
 0x31f   : > { %v2131_v12 = vrot.slane %v1948_v48, %v3730_v57  ;;  %v2135_v51 = vrot.slane %v1951_v29, %v3730_v57 }
 0x321   : > { %v2273_v61 = vsel %vm2272_vm15, %v2135_v51, %v2131_v12 }
 0x322   : > { %v1954_v63 = vpop.xlane.xlu0 %1953  ;;  %v3793_v25 = vpop.xlane.xlu1 %1974 }
 0x323   : > { %v2139_v54 = vrot.slane %v1954_v63, %v3730_v57  ;;  %v2167_v3 = vrot.slane %v3793_v25, %v3730_v57 }
 0x325   : > { %v2274_v28 = vsel %vm893_vm2, %v2139_v54, %v2273_v61 }
 0x326   : > { %v1957_v39 = vpop.xlane.xlu0 %1956  ;;  %v2002_v19 = vpop.xlane.xlu1 %2001 }
 0x327   : > { %v2143_v52 = vrot.slane %v1957_v39, %v3730_v57  ;;  %v2203_v22 = vrot.slane %v2002_v19, %v3730_v57 }
 0x329   : > { %v2275_v37 = vsel %vm895_vm3, %v2143_v52, %v2274_v28 }
 0x32a   : > { %v1978_v20 = vpop.xlane.xlu0 %1977  ;;  %v3795_v11 = vpop.xlane.xlu1 %2028 }
 0x32b   : > { %v2171_v41 = vrot.slane %v1978_v20, %v3730_v57  ;;  %v2239_v10 = vrot.slane %v3795_v11, %v3730_v57 }
 0x32d   : > { %v2280_v29 = vsel %vm2272_vm15, %v2171_v41, %v2167_v3 }
 0x32e   : > { %v2005_v58 = vpop.xlane.xlu0 %2004  ;;  %v3797_v55 = vpop.xlane.xlu1 %1980 }
 0x32f   : > { %v2207_v2 = vrot.slane %v2005_v58, %v3730_v57  ;;  %v2175_v43 = vrot.slane %v3797_v55, %v3730_v57 }
 0x331   : > { %v2287_v53 = vsel %vm2272_vm15, %v2207_v2, %v2203_v22  ;;  %v2281_v19 = vsel %vm893_vm2, %v2175_v43, %v2280_v29 }
 0x332   : > { %v3799_v6 = vpop.xlane.xlu0 %2031  ;;  %v3801_v56 = vpop.xlane.xlu1 %2034 }
 0x333   : > { %v2243_v46 = vrot.slane %v3799_v6, %v3730_v57  ;;  %v2247_v20 = vrot.slane %v3801_v56, %v3730_v57 }
 0x335   : > { %v2294_v55 = vsel %vm2272_vm15, %v2243_v46, %v2239_v10 }
 0x336   : > { %v2008_v31 = vpop.xlane.xlu0 %2007  ;;  %v2011_v40 = vpop.xlane.xlu1 %2010 }
 0x337   : > { %v2211_v15 = vrot.slane %v2008_v31, %v3730_v57  ;;  %v2215_v21 = vrot.slane %v2011_v40, %v3730_v57 }
 0x339   : > { %v2288_v34 = vsel %vm893_vm2, %v2211_v15, %v2287_v53 }
 0x33a   : > { %v3803_v26 = vpop.xlane.xlu0 %1983  ;;  %v1960_v45 = vpop.xlane.xlu1 %1959  ;;  %v2289_v23 = vsel %vm895_vm3, %v2215_v21, %v2288_v34 }
 0x33b   : > { %v2147_v35 = vrot.slane %v1960_v45, %v3730_v57  ;;  %v2179_v5 = vrot.slane %v3803_v26, %v3730_v57 }
 0x33d   : > { %v2276_v8 = vsel %vm897_vm4, %v2147_v35, %v2275_v37  ;;  %v2282_v6 = vsel %vm895_vm3, %v2179_v5, %v2281_v19 }
 0x33e   : > { %v3805_v16 = vpop.xlane.xlu0 %2037  ;;  %v2014_v1 = vpop.xlane.xlu1 %2013 }
 0x33f   : > { %v2219_v50 = vrot.slane %v2014_v1, %v3730_v57  ;;  %v2251_v31 = vrot.slane %v3805_v16, %v3730_v57 }
 0x341   : > { %v2290_v13 = vsel %vm897_vm4, %v2219_v50, %v2289_v23 }
 0x342   : > { %v1987_v24 = vpop.xlane.xlu0 %1986  ;;  %v1963_v18 = vpop.xlane.xlu1 %1962 }
 0x343   : > { %v2151_v38 = vrot.slane %v1963_v18, %v3730_v57  ;;  %v2183_v36 = vrot.slane %v1987_v24, %v3730_v57 }
 0x345   : > { %v2277_v9 = vsel %vm899_vm5, %v2151_v38, %v2276_v8  ;;  %v2283_v26 = vsel %vm897_vm4, %v2183_v36, %v2282_v6 }
 0x346   : > { %v3807_v47 = vpop.xlane.xlu0 %2040  ;;  %v2017_v7 = vpop.xlane.xlu1 %2016 }
 0x347   : > { %v2223_v59 = vrot.slane %v2017_v7, %v3730_v57  ;;  %v2255_v45 = vrot.slane %v3807_v47, %v3730_v57  ;;  %v2295_v7 = vsel %vm893_vm2, %v2247_v20, %v2294_v55 }
 0x349   : > { %v2291_v63 = vsel %vm899_vm5, %v2223_v59, %v2290_v13 }
 0x34a   : > { %v3809_v44 = vpop.xlane.xlu0 %1989  ;;  %v1966_v30 = vpop.xlane.xlu1 %1965 }
 0x34b   : > { %v2155_v62 = vrot.slane %v1966_v30, %v3730_v57  ;;  %v2187_v25 = vrot.slane %v3809_v44, %v3730_v57  ;;  %v2296_v30 = vsel %vm895_vm3, %v2251_v31, %v2295_v7 }
 0x34c   : > { %v2297_v51 = vsel %vm897_vm4, %v2255_v45, %v2296_v30 }
 0x34d   : > { %v2278_v42 = vsel %vm901_vm6, %v2155_v62, %v2277_v9  ;;  %v2284_v24 = vsel %vm899_vm5, %v2187_v25, %v2283_v26 }
 0x34e   : > { %v3818_v17 = vpop.xlane.xlu0 %2043  ;;  %v2020_v4 = vpop.xlane.xlu1 %2019 }
 0x34f   : > { %v2227_v32 = vrot.slane %v2020_v4, %v3730_v57  ;;  %v2259_v18 = vrot.slane %v3818_v17, %v3730_v57  ;;  %v2271_v17 = vrot.slane %v3791_v0, %v3730_v57 }
 0x351   : > { %v2292_v11 = vsel %vm901_vm6, %v2227_v32, %v2291_v63  ;;  %v2298_v52 = vsel %vm899_vm5, %v2259_v18, %v2297_v51 }
 0x352   : > { %v1993_v33 = vpop.xlane.xlu0 %1992  ;;  %v1969_v27 = vpop.xlane.xlu1 %1968 }
 0x353   : > { %v2159_v49 = vrot.slane %v1969_v27, %v3730_v57  ;;  %v2191_v58 = vrot.slane %v1993_v33, %v3730_v57 }
 0x355   : > { %v2279_v60 = vsel %vm903_vm7, %v2159_v49, %v2278_v42  ;;  %v2285_v47 = vsel %vm901_vm6, %v2191_v58, %v2284_v24 }
 0x356   : > { %2310 = vst.msk [vmem:[%s3248_s29] sm:$0xff] %vm2309_vm0, %v2279_v60  ;;  %v2047_v14 = vpop.xlane.xlu0 %2046  ;;  %v2023_v48 = vpop.xlane.xlu1 %2022 }
 0x357   : > { %v2231_v39 = vrot.slane %v2023_v48, %v3730_v57  ;;  %v2263_v44 = vrot.slane %v2047_v14, %v3730_v57 }
 0x359   : > { %v2293_v40 = vsel %vm903_vm7, %v2231_v39, %v2292_v11  ;;  %v2299_v15 = vsel %vm901_vm6, %v2263_v44, %v2298_v52 }
 0x35a   : > { %2315 = vst.msk [vmem:[%s3248_s29 + $0x20] sm:$0xff] %vm2309_vm0, %v2293_v40  ;;  %v1996_v56 = vpop.xlane.xlu0 %1995  ;;  %v2075_v1 = vpop.xlane.xlu1 %2074 }
 0x35b   : > { %v2195_v16 = vrot.slane %v1996_v56, %v3730_v57  ;;  %2087 = vst.msk [vmem:[%s3248_s29 + $0x30] sm:$0xff] %vm2079_vm13, %v2075_v1 }
 0x35d   : > { %v2286_v12 = vsel %vm903_vm7, %v2195_v16, %v2285_v47 }
 0x35e   : > { %2313 = vst.msk [vmem:[%s3248_s29 + $0x10] sm:$0xff] %vm2309_vm0, %v2286_v12  ;;  %v2050_v54 = vpop.xlane.xlu0 %2049 }
 0x35f   : > { %v2267_v2 = vrot.slane %v2050_v54, %v3730_v57 }
 0x361   : > { %v2300_v35 = vsel %vm903_vm7, %v2267_v2, %v2299_v15 }
 0x362   : > { %2317 = vst.msk [vmem:[%s3248_s29 + $0x30] sm:$0xff] %vm2309_vm0, %v2300_v35  ;;  %v2078_v4 = vpop.xlane.xlu0 %2077 }
 0x363   : > { %2088 = vst.msk [vmem:[%s3248_s29 + $0x38] sm:$0x1] %vm2081_vm12, %v2078_v4 }
 0x364   : > { %2318 = vst.msk [vmem:[%s3248_s29 + $0x38] sm:$0x1] %vm2311_vm14, %v2271_v17 }
 0x365 PF: > { %s19_s17 = sadd.s32 1, %s2715_s17   ;;  %s3942_s12 = smov %s2699_s13 }
 0x366   : > { %p16_p2 = scmp.ge.s32.totalorder %s19_s17, 4   ;;  %s3943_s13 = smov %s2703_s14 }
 0x367   : > { %s3944_s14 = smov %s2799_s23  ;;  %s3945_s15 = smov %s2711_s16 }
 0x368   : > { %s3946_s16 = smov %s3948_s19  ;;  %18 = sbr.rel (!%p16_p2) target bundleno = 6 (0x6), region = 96 }
 0x36f   :  { %2351 = vsyncpa [#allocation3], 1 }
 0x370   :  { %2353 = vsyncpa [#allocation3 + $0x1], 1 }
 0x371   :  { %2354 = vsyncpa [#allocation5], 1 }
 0x372   :  { %2356 = vsyncpa [#allocation5 + $0x1], 1 }

</bundles_post_ra>
